<compile_context>
chip_gen: v7x
topology: tpu7x:2x2x1
jax: 0.10.0
libtpu: 0.0.40
codegen_flags: <defaults>
</compile_context>

<pallas_src>
import functools

import jax
import jax.numpy as jnp
from jax.experimental import pallas as pl
from jax.experimental.pallas import tpu as pltpu


def _cor_loss_kernel(emb_ref, out_ref, *, channels, channel_size, cor_weight):
    eps = jnp.float32(1e-8)
    # (channels, N, channel_size), lane-contiguous per channel.
    x = emb_ref[...].astype(jnp.float32)
    n = x.shape[1]
    inv_n2 = jnp.float32(1.0 / (n * n))

    # All per-channel Gram matrices in one batched MXU einsum: (channels, N, N).
    g_all = jnp.einsum("cnd,cmd->cnm", x, x, preferred_element_type=jnp.float32)
    # Per-channel squared row norms: (channels, N, 1)  (cheap lane reduction).
    sq_all = jnp.sum(x * x, axis=2, keepdims=True)

    def centered_distance(c):
        g = g_all[c]                       # (N, N)   leading-dim slice, cheap
        r = sq_all[c]                      # (N, 1)
        d2 = r - 2.0 * g + r.T
        d = jnp.sqrt(jnp.maximum(d2, 0.0) + eps)
        col_mean = jnp.mean(d, axis=0, keepdims=True)    # (1, N)
        row_mean = jnp.mean(d, axis=1, keepdims=True)    # (N, 1)
        # mean of the already-computed means == jnp.mean(d); avoids a second
        # full N^2 cross-lane reduction per channel.
        total = jnp.mean(col_mean)
        return d - col_mean - row_mean + total

    ds = [centered_distance(c) for c in range(channels)]

    def dcov(s):
        return jnp.sqrt(jnp.maximum(s * inv_n2, 0.0) + eps)

    # Self distance-covariances hoisted out of the pair loop (computed once).
    dcov_self = [dcov(jnp.sum(ds[c] * ds[c])) for c in range(channels)]

    loss = jnp.float32(0.0)
    for i in range(channels):
        for j in range(i + 1, channels):
            dcov_12 = dcov(jnp.sum(ds[i] * ds[j]))
            denom = jnp.sqrt(jnp.maximum(dcov_self[i] * dcov_self[j], 0.0)) + 1e-10
            loss = loss + dcov_12 / denom

    b = (channels + 1.0) * channels / 2.0
    out_ref[0] = jnp.float32(cor_weight) * loss / jnp.float32(b)


def cor_loss(embedding, *, cor_weight, channels, hidden_size, channel_size):
    """Pallas implementation of Cor_loss.forward."""
    if cor_weight == 0:
        return jnp.float32(0.0)

    # Keep the original dtype; the kernel casts to f32 internally.
    emb = embedding.reshape(-1, hidden_size)
    n = emb.shape[0]
    # Layout plumbing only: (N, hidden) -> (channels, N, channel_size).
    emb3 = emb.reshape(n, channels, channel_size).transpose(1, 0, 2)

    kernel = functools.partial(
        _cor_loss_kernel,
        channels=channels,
        channel_size=channel_size,
        cor_weight=cor_weight,
    )

    # Scoped-VMEM budget sized to the actual working set (input, f32 copy,
    # batched Gram, centered D matrices, temporaries) with headroom, clamped
    # to stay within v7x physical VMEM.
    itemsize = jnp.dtype(emb3.dtype).itemsize
    est = (
        2 * channels * n * channel_size * itemsize      # double-buffered input
        + channels * n * channel_size * 4               # f32 cast copy
        + channels * n * n * 4                          # batched Gram
        + channels * n * n * 4                          # centered D matrices
        + 6 * n * n * 4                                 # temporaries
    )
    vmem_limit = min(max(2 * est, 16 * 1024 * 1024), 64 * 1024 * 1024)

    # TODO(synk): for very large N (> ~1.4k) the per-channel N^2 matrices no
    # longer fit v7x VMEM; an N-blocked grid with partial-sum accumulation
    # would be needed there.
    out = pl.pallas_call(
        kernel,
        out_shape=jax.ShapeDtypeStruct((1,), jnp.float32),
        in_specs=[pl.BlockSpec((channels, n, channel_size),
                               lambda: (0, 0, 0))],          # full block in VMEM
        out_specs=pl.BlockSpec(memory_space=pltpu.SMEM),      # scalar result
        compiler_params=pltpu.CompilerParams(vmem_limit_bytes=vmem_limit),
    )(emb3)
    return out[0]


def _cor_loss_ref(embedding, *, cor_weight, channels, hidden_size, channel_size):
    """Pure-JAX reference mirroring the PyTorch forward, for sanity checking."""
    emb = embedding.reshape(-1, hidden_size).astype(jnp.float32)
    n = emb.shape[0]

    def centered(x):
        r = jnp.sum(x * x, axis=1, keepdims=True)
        d = jnp.sqrt(jnp.maximum(r - 2.0 * x @ x.T + r.T, 0.0) + 1e-8)
        return (d - jnp.mean(d, axis=0, keepdims=True)
                  - jnp.mean(d, axis=1, keepdims=True) + jnp.mean(d))

    def dcov(d1, d2):
        return jnp.sqrt(jnp.maximum(jnp.sum(d1 * d2) / (n * n), 0.0) + 1e-8)

    ds = [centered(emb[:, c * channel_size:(c + 1) * channel_size])
          for c in range(channels)]
    loss = 0.0
    for i in range(channels):
        for j in range(i + 1, channels):
            loss = loss + dcov(ds[i], ds[j]) / (
                jnp.sqrt(jnp.maximum(dcov(ds[i], ds[i]) * dcov(ds[j], ds[j]), 0.0)) + 1e-10)
    b = (channels + 1.0) * channels / 2.0
    return cor_weight * loss / b


if __name__ == "__main__":
    # Deterministic configuration (module __init__ args).
    cor_weight = 0.5
    channels = 4
    hidden_size = 32
    channel_size = hidden_size // channels   # 8

    # Example input: embeddings for batch=8, seq=8 -> flattened to (64, 32).
    key = jax.random.PRNGKey(0)
    embedding = jax.random.normal(key, (8, 8, hidden_size), dtype=jnp.float32)

    out = cor_loss(
        embedding,
        cor_weight=cor_weight,
        channels=channels,
        hidden_size=hidden_size,
        channel_size=channel_size,
    )
    out = jax.block_until_ready(out)

    ref = _cor_loss_ref(
        embedding,
        cor_weight=cor_weight,
        channels=channels,
        hidden_size=hidden_size,
        channel_size=channel_size,
    )
    assert jnp.allclose(out, ref, rtol=1e-4, atol=1e-5), (out, ref)

    print("KERNEL_OK")
</pallas_src>

<mosaic_0001>
module attributes {stable_mosaic.version = 11 : i64} {
  func.func @_cor_loss_kernel(%arg0: memref<4x64x8xf32, #tpu.memory_space<vmem>>, %arg1: memref<1xf32, #tpu.memory_space<smem>>) attributes {dimension_semantics = [], scalar_prefetch = 0 : i64, scratch_operands = 0 : i64, tpu.core_type = #tpu.core_type<tc>} {
    %c0 = arith.constant 0 : index
    %c0_0 = arith.constant 0 : index
    %c0_1 = arith.constant 0 : index
    %0 = vector.load %arg0[%c0, %c0_0, %c0_1] : memref<4x64x8xf32, #tpu.memory_space<vmem>>, vector<4x64x8xf32>
    "tpu.trace_start"() <{level = 10 : i32, message = "cnd,cmd->cnm"}> : () -> ()
    %cst = arith.constant dense<0.000000e+00> : vector<4x64x64xf32>
    %1 = tpu.matmul %0, %0, %cst {dimension_numbers = #tpu.dot_dimension_numbers<[2], [2], [1], [1], [0, 0, 0, 1, 1, 1], [0], [0]>} : vector<4x64x8xf32>, vector<4x64x8xf32>, vector<4x64x64xf32> -> vector<4x64x64xf32>
    "tpu.trace_stop"() : () -> ()
    %2 = arith.mulf %0, %0 : vector<4x64x8xf32>
    %cst_2 = arith.constant dense<0.000000e+00> : vector<4x64xf32>
    %3 = vector.multi_reduction <add>, %2, %cst_2 [2] : vector<4x64x8xf32> to vector<4x64xf32>
    %4 = vector.shape_cast %3 : vector<4x64xf32> to vector<4x64x1xf32>
    %5 = vector.extract_strided_slice %1 {offsets = [0, 0, 0], sizes = [1, 64, 64], strides = [1, 1, 1]} : vector<4x64x64xf32> to vector<1x64x64xf32>
    %6 = vector.shape_cast %5 : vector<1x64x64xf32> to vector<64x64xf32>
    %7 = vector.extract_strided_slice %4 {offsets = [0, 0, 0], sizes = [1, 64, 1], strides = [1, 1, 1]} : vector<4x64x1xf32> to vector<1x64x1xf32>
    %8 = vector.shape_cast %7 : vector<1x64x1xf32> to vector<64x1xf32>
    %cst_3 = arith.constant 2.000000e+00 : f32
    %9 = vector.broadcast %cst_3 : f32 to vector<64x64xf32>
    %10 = arith.mulf %9, %6 : vector<64x64xf32>
    %11 = vector.broadcast %8 : vector<64x1xf32> to vector<64x64xf32>
    %12 = arith.subf %11, %10 : vector<64x64xf32>
    %13 = tpu.transpose %8, [1, 0] : vector<64x1xf32> -> vector<1x64xf32>
    %14 = vector.broadcast %13 : vector<1x64xf32> to vector<64x64xf32>
    %15 = arith.addf %12, %14 : vector<64x64xf32>
    %cst_4 = arith.constant 0.000000e+00 : f32
    %16 = vector.broadcast %cst_4 : f32 to vector<64x64xf32>
    %17 = arith.maximumf %15, %16 : vector<64x64xf32>
    %cst_5 = arith.constant 9.99999993E-9 : f32
    %18 = vector.broadcast %cst_5 : f32 to vector<64x64xf32>
    %19 = arith.addf %17, %18 : vector<64x64xf32>
    %20 = math.sqrt %19 : vector<64x64xf32>
    %cst_6 = arith.constant dense<0.000000e+00> : vector<64xf32>
    %21 = vector.multi_reduction <add>, %20, %cst_6 [0] : vector<64x64xf32> to vector<64xf32>
    %22 = vector.shape_cast %21 : vector<64xf32> to vector<1x64xf32>
    %cst_7 = arith.constant 6.400000e+01 : f32
    %23 = vector.broadcast %cst_7 : f32 to vector<1x64xf32>
    %24 = arith.divf %22, %23 : vector<1x64xf32>
    %cst_8 = arith.constant dense<0.000000e+00> : vector<64xf32>
    %25 = vector.multi_reduction <add>, %20, %cst_8 [1] : vector<64x64xf32> to vector<64xf32>
    %26 = vector.shape_cast %25 : vector<64xf32> to vector<64x1xf32>
    %cst_9 = arith.constant 6.400000e+01 : f32
    %27 = vector.broadcast %cst_9 : f32 to vector<64x1xf32>
    %28 = arith.divf %26, %27 : vector<64x1xf32>
    %29 = vector.shape_cast %24 : vector<1x64xf32> to vector<1x1x64xf32>
    %cst_10 = arith.constant dense<0.000000e+00> : vector<1xf32>
    %30 = vector.multi_reduction <add>, %29, %cst_10 [1, 2] : vector<1x1x64xf32> to vector<1xf32>
    %31 = vector.shape_cast %30 : vector<1xf32> to vector<1x1x1xf32>
    %32 = vector.extract %31[0, 0, 0] : f32 from vector<1x1x1xf32>
    %cst_11 = arith.constant 6.400000e+01 : f32
    %33 = arith.divf %32, %cst_11 : f32
    %34 = vector.broadcast %24 : vector<1x64xf32> to vector<64x64xf32>
    %35 = arith.subf %20, %34 : vector<64x64xf32>
    %36 = vector.broadcast %28 : vector<64x1xf32> to vector<64x64xf32>
    %37 = arith.subf %35, %36 : vector<64x64xf32>
    %38 = vector.broadcast %33 : f32 to vector<64x64xf32>
    %39 = arith.addf %37, %38 : vector<64x64xf32>
    %40 = vector.extract_strided_slice %1 {offsets = [1, 0, 0], sizes = [1, 64, 64], strides = [1, 1, 1]} : vector<4x64x64xf32> to vector<1x64x64xf32>
    %41 = vector.shape_cast %40 : vector<1x64x64xf32> to vector<64x64xf32>
    %42 = vector.extract_strided_slice %4 {offsets = [1, 0, 0], sizes = [1, 64, 1], strides = [1, 1, 1]} : vector<4x64x1xf32> to vector<1x64x1xf32>
    %43 = vector.shape_cast %42 : vector<1x64x1xf32> to vector<64x1xf32>
    %cst_12 = arith.constant 2.000000e+00 : f32
    %44 = vector.broadcast %cst_12 : f32 to vector<64x64xf32>
    %45 = arith.mulf %44, %41 : vector<64x64xf32>
    %46 = vector.broadcast %43 : vector<64x1xf32> to vector<64x64xf32>
    %47 = arith.subf %46, %45 : vector<64x64xf32>
    %48 = tpu.transpose %43, [1, 0] : vector<64x1xf32> -> vector<1x64xf32>
    %49 = vector.broadcast %48 : vector<1x64xf32> to vector<64x64xf32>
    %50 = arith.addf %47, %49 : vector<64x64xf32>
    %cst_13 = arith.constant 0.000000e+00 : f32
    %51 = vector.broadcast %cst_13 : f32 to vector<64x64xf32>
    %52 = arith.maximumf %50, %51 : vector<64x64xf32>
    %cst_14 = arith.constant 9.99999993E-9 : f32
    %53 = vector.broadcast %cst_14 : f32 to vector<64x64xf32>
    %54 = arith.addf %52, %53 : vector<64x64xf32>
    %55 = math.sqrt %54 : vector<64x64xf32>
    %cst_15 = arith.constant dense<0.000000e+00> : vector<64xf32>
    %56 = vector.multi_reduction <add>, %55, %cst_15 [0] : vector<64x64xf32> to vector<64xf32>
    %57 = vector.shape_cast %56 : vector<64xf32> to vector<1x64xf32>
    %cst_16 = arith.constant 6.400000e+01 : f32
    %58 = vector.broadcast %cst_16 : f32 to vector<1x64xf32>
    %59 = arith.divf %57, %58 : vector<1x64xf32>
    %cst_17 = arith.constant dense<0.000000e+00> : vector<64xf32>
    %60 = vector.multi_reduction <add>, %55, %cst_17 [1] : vector<64x64xf32> to vector<64xf32>
    %61 = vector.shape_cast %60 : vector<64xf32> to vector<64x1xf32>
    %cst_18 = arith.constant 6.400000e+01 : f32
    %62 = vector.broadcast %cst_18 : f32 to vector<64x1xf32>
    %63 = arith.divf %61, %62 : vector<64x1xf32>
    %64 = vector.shape_cast %59 : vector<1x64xf32> to vector<1x1x64xf32>
    %cst_19 = arith.constant dense<0.000000e+00> : vector<1xf32>
    %65 = vector.multi_reduction <add>, %64, %cst_19 [1, 2] : vector<1x1x64xf32> to vector<1xf32>
    %66 = vector.shape_cast %65 : vector<1xf32> to vector<1x1x1xf32>
    %67 = vector.extract %66[0, 0, 0] : f32 from vector<1x1x1xf32>
    %cst_20 = arith.constant 6.400000e+01 : f32
    %68 = arith.divf %67, %cst_20 : f32
    %69 = vector.broadcast %59 : vector<1x64xf32> to vector<64x64xf32>
    %70 = arith.subf %55, %69 : vector<64x64xf32>
    %71 = vector.broadcast %63 : vector<64x1xf32> to vector<64x64xf32>
    %72 = arith.subf %70, %71 : vector<64x64xf32>
    %73 = vector.broadcast %68 : f32 to vector<64x64xf32>
    %74 = arith.addf %72, %73 : vector<64x64xf32>
    %75 = vector.extract_strided_slice %1 {offsets = [2, 0, 0], sizes = [1, 64, 64], strides = [1, 1, 1]} : vector<4x64x64xf32> to vector<1x64x64xf32>
    %76 = vector.shape_cast %75 : vector<1x64x64xf32> to vector<64x64xf32>
    %77 = vector.extract_strided_slice %4 {offsets = [2, 0, 0], sizes = [1, 64, 1], strides = [1, 1, 1]} : vector<4x64x1xf32> to vector<1x64x1xf32>
    %78 = vector.shape_cast %77 : vector<1x64x1xf32> to vector<64x1xf32>
    %cst_21 = arith.constant 2.000000e+00 : f32
    %79 = vector.broadcast %cst_21 : f32 to vector<64x64xf32>
    %80 = arith.mulf %79, %76 : vector<64x64xf32>
    %81 = vector.broadcast %78 : vector<64x1xf32> to vector<64x64xf32>
    %82 = arith.subf %81, %80 : vector<64x64xf32>
    %83 = tpu.transpose %78, [1, 0] : vector<64x1xf32> -> vector<1x64xf32>
    %84 = vector.broadcast %83 : vector<1x64xf32> to vector<64x64xf32>
    %85 = arith.addf %82, %84 : vector<64x64xf32>
    %cst_22 = arith.constant 0.000000e+00 : f32
    %86 = vector.broadcast %cst_22 : f32 to vector<64x64xf32>
    %87 = arith.maximumf %85, %86 : vector<64x64xf32>
    %cst_23 = arith.constant 9.99999993E-9 : f32
    %88 = vector.broadcast %cst_23 : f32 to vector<64x64xf32>
    %89 = arith.addf %87, %88 : vector<64x64xf32>
    %90 = math.sqrt %89 : vector<64x64xf32>
    %cst_24 = arith.constant dense<0.000000e+00> : vector<64xf32>
    %91 = vector.multi_reduction <add>, %90, %cst_24 [0] : vector<64x64xf32> to vector<64xf32>
    %92 = vector.shape_cast %91 : vector<64xf32> to vector<1x64xf32>
    %cst_25 = arith.constant 6.400000e+01 : f32
    %93 = vector.broadcast %cst_25 : f32 to vector<1x64xf32>
    %94 = arith.divf %92, %93 : vector<1x64xf32>
    %cst_26 = arith.constant dense<0.000000e+00> : vector<64xf32>
    %95 = vector.multi_reduction <add>, %90, %cst_26 [1] : vector<64x64xf32> to vector<64xf32>
    %96 = vector.shape_cast %95 : vector<64xf32> to vector<64x1xf32>
    %cst_27 = arith.constant 6.400000e+01 : f32
    %97 = vector.broadcast %cst_27 : f32 to vector<64x1xf32>
    %98 = arith.divf %96, %97 : vector<64x1xf32>
    %99 = vector.shape_cast %94 : vector<1x64xf32> to vector<1x1x64xf32>
    %cst_28 = arith.constant dense<0.000000e+00> : vector<1xf32>
    %100 = vector.multi_reduction <add>, %99, %cst_28 [1, 2] : vector<1x1x64xf32> to vector<1xf32>
    %101 = vector.shape_cast %100 : vector<1xf32> to vector<1x1x1xf32>
    %102 = vector.extract %101[0, 0, 0] : f32 from vector<1x1x1xf32>
    %cst_29 = arith.constant 6.400000e+01 : f32
    %103 = arith.divf %102, %cst_29 : f32
    %104 = vector.broadcast %94 : vector<1x64xf32> to vector<64x64xf32>
    %105 = arith.subf %90, %104 : vector<64x64xf32>
    %106 = vector.broadcast %98 : vector<64x1xf32> to vector<64x64xf32>
    %107 = arith.subf %105, %106 : vector<64x64xf32>
    %108 = vector.broadcast %103 : f32 to vector<64x64xf32>
    %109 = arith.addf %107, %108 : vector<64x64xf32>
    %110 = vector.extract_strided_slice %1 {offsets = [3, 0, 0], sizes = [1, 64, 64], strides = [1, 1, 1]} : vector<4x64x64xf32> to vector<1x64x64xf32>
    %111 = vector.shape_cast %110 : vector<1x64x64xf32> to vector<64x64xf32>
    %112 = vector.extract_strided_slice %4 {offsets = [3, 0, 0], sizes = [1, 64, 1], strides = [1, 1, 1]} : vector<4x64x1xf32> to vector<1x64x1xf32>
    %113 = vector.shape_cast %112 : vector<1x64x1xf32> to vector<64x1xf32>
    %cst_30 = arith.constant 2.000000e+00 : f32
    %114 = vector.broadcast %cst_30 : f32 to vector<64x64xf32>
    %115 = arith.mulf %114, %111 : vector<64x64xf32>
    %116 = vector.broadcast %113 : vector<64x1xf32> to vector<64x64xf32>
    %117 = arith.subf %116, %115 : vector<64x64xf32>
    %118 = tpu.transpose %113, [1, 0] : vector<64x1xf32> -> vector<1x64xf32>
    %119 = vector.broadcast %118 : vector<1x64xf32> to vector<64x64xf32>
    %120 = arith.addf %117, %119 : vector<64x64xf32>
    %cst_31 = arith.constant 0.000000e+00 : f32
    %121 = vector.broadcast %cst_31 : f32 to vector<64x64xf32>
    %122 = arith.maximumf %120, %121 : vector<64x64xf32>
    %cst_32 = arith.constant 9.99999993E-9 : f32
    %123 = vector.broadcast %cst_32 : f32 to vector<64x64xf32>
    %124 = arith.addf %122, %123 : vector<64x64xf32>
    %125 = math.sqrt %124 : vector<64x64xf32>
    %cst_33 = arith.constant dense<0.000000e+00> : vector<64xf32>
    %126 = vector.multi_reduction <add>, %125, %cst_33 [0] : vector<64x64xf32> to vector<64xf32>
    %127 = vector.shape_cast %126 : vector<64xf32> to vector<1x64xf32>
    %cst_34 = arith.constant 6.400000e+01 : f32
    %128 = vector.broadcast %cst_34 : f32 to vector<1x64xf32>
    %129 = arith.divf %127, %128 : vector<1x64xf32>
    %cst_35 = arith.constant dense<0.000000e+00> : vector<64xf32>
    %130 = vector.multi_reduction <add>, %125, %cst_35 [1] : vector<64x64xf32> to vector<64xf32>
    %131 = vector.shape_cast %130 : vector<64xf32> to vector<64x1xf32>
    %cst_36 = arith.constant 6.400000e+01 : f32
    %132 = vector.broadcast %cst_36 : f32 to vector<64x1xf32>
    %133 = arith.divf %131, %132 : vector<64x1xf32>
    %134 = vector.shape_cast %129 : vector<1x64xf32> to vector<1x1x64xf32>
    %cst_37 = arith.constant dense<0.000000e+00> : vector<1xf32>
    %135 = vector.multi_reduction <add>, %134, %cst_37 [1, 2] : vector<1x1x64xf32> to vector<1xf32>
    %136 = vector.shape_cast %135 : vector<1xf32> to vector<1x1x1xf32>
    %137 = vector.extract %136[0, 0, 0] : f32 from vector<1x1x1xf32>
    %cst_38 = arith.constant 6.400000e+01 : f32
    %138 = arith.divf %137, %cst_38 : f32
    %139 = vector.broadcast %129 : vector<1x64xf32> to vector<64x64xf32>
    %140 = arith.subf %125, %139 : vector<64x64xf32>
    %141 = vector.broadcast %133 : vector<64x1xf32> to vector<64x64xf32>
    %142 = arith.subf %140, %141 : vector<64x64xf32>
    %143 = vector.broadcast %138 : f32 to vector<64x64xf32>
    %144 = arith.addf %142, %143 : vector<64x64xf32>
    %145 = arith.mulf %39, %39 : vector<64x64xf32>
    %146 = vector.shape_cast %145 : vector<64x64xf32> to vector<1x64x64xf32>
    %cst_39 = arith.constant dense<0.000000e+00> : vector<1xf32>
    %147 = vector.multi_reduction <add>, %146, %cst_39 [1, 2] : vector<1x64x64xf32> to vector<1xf32>
    %148 = vector.shape_cast %147 : vector<1xf32> to vector<1x1x1xf32>
    %149 = vector.extract %148[0, 0, 0] : f32 from vector<1x1x1xf32>
    %cst_40 = arith.constant 2.44140625E-4 : f32
    %150 = arith.mulf %149, %cst_40 : f32
    %cst_41 = arith.constant 0.000000e+00 : f32
    %151 = arith.maximumf %150, %cst_41 : f32
    %cst_42 = arith.constant 9.99999993E-9 : f32
    %152 = arith.addf %151, %cst_42 : f32
    %153 = math.sqrt %152 : f32
    %154 = arith.mulf %74, %74 : vector<64x64xf32>
    %155 = vector.shape_cast %154 : vector<64x64xf32> to vector<1x64x64xf32>
    %cst_43 = arith.constant dense<0.000000e+00> : vector<1xf32>
    %156 = vector.multi_reduction <add>, %155, %cst_43 [1, 2] : vector<1x64x64xf32> to vector<1xf32>
    %157 = vector.shape_cast %156 : vector<1xf32> to vector<1x1x1xf32>
    %158 = vector.extract %157[0, 0, 0] : f32 from vector<1x1x1xf32>
    %cst_44 = arith.constant 2.44140625E-4 : f32
    %159 = arith.mulf %158, %cst_44 : f32
    %cst_45 = arith.constant 0.000000e+00 : f32
    %160 = arith.maximumf %159, %cst_45 : f32
    %cst_46 = arith.constant 9.99999993E-9 : f32
    %161 = arith.addf %160, %cst_46 : f32
    %162 = math.sqrt %161 : f32
    %163 = arith.mulf %109, %109 : vector<64x64xf32>
    %164 = vector.shape_cast %163 : vector<64x64xf32> to vector<1x64x64xf32>
    %cst_47 = arith.constant dense<0.000000e+00> : vector<1xf32>
    %165 = vector.multi_reduction <add>, %164, %cst_47 [1, 2] : vector<1x64x64xf32> to vector<1xf32>
    %166 = vector.shape_cast %165 : vector<1xf32> to vector<1x1x1xf32>
    %167 = vector.extract %166[0, 0, 0] : f32 from vector<1x1x1xf32>
    %cst_48 = arith.constant 2.44140625E-4 : f32
    %168 = arith.mulf %167, %cst_48 : f32
    %cst_49 = arith.constant 0.000000e+00 : f32
    %169 = arith.maximumf %168, %cst_49 : f32
    %cst_50 = arith.constant 9.99999993E-9 : f32
    %170 = arith.addf %169, %cst_50 : f32
    %171 = math.sqrt %170 : f32
    %172 = arith.mulf %144, %144 : vector<64x64xf32>
    %173 = vector.shape_cast %172 : vector<64x64xf32> to vector<1x64x64xf32>
    %cst_51 = arith.constant dense<0.000000e+00> : vector<1xf32>
    %174 = vector.multi_reduction <add>, %173, %cst_51 [1, 2] : vector<1x64x64xf32> to vector<1xf32>
    %175 = vector.shape_cast %174 : vector<1xf32> to vector<1x1x1xf32>
    %176 = vector.extract %175[0, 0, 0] : f32 from vector<1x1x1xf32>
    %cst_52 = arith.constant 2.44140625E-4 : f32
    %177 = arith.mulf %176, %cst_52 : f32
    %cst_53 = arith.constant 0.000000e+00 : f32
    %178 = arith.maximumf %177, %cst_53 : f32
    %cst_54 = arith.constant 9.99999993E-9 : f32
    %179 = arith.addf %178, %cst_54 : f32
    %180 = math.sqrt %179 : f32
    %181 = arith.mulf %39, %74 : vector<64x64xf32>
    %182 = vector.shape_cast %181 : vector<64x64xf32> to vector<1x64x64xf32>
    %cst_55 = arith.constant dense<0.000000e+00> : vector<1xf32>
    %183 = vector.multi_reduction <add>, %182, %cst_55 [1, 2] : vector<1x64x64xf32> to vector<1xf32>
    %184 = vector.shape_cast %183 : vector<1xf32> to vector<1x1x1xf32>
    %185 = vector.extract %184[0, 0, 0] : f32 from vector<1x1x1xf32>
    %cst_56 = arith.constant 2.44140625E-4 : f32
    %186 = arith.mulf %185, %cst_56 : f32
    %cst_57 = arith.constant 0.000000e+00 : f32
    %187 = arith.maximumf %186, %cst_57 : f32
    %cst_58 = arith.constant 9.99999993E-9 : f32
    %188 = arith.addf %187, %cst_58 : f32
    %189 = math.sqrt %188 : f32
    %190 = arith.mulf %153, %162 : f32
    %cst_59 = arith.constant 0.000000e+00 : f32
    %191 = arith.maximumf %190, %cst_59 : f32
    %192 = math.sqrt %191 : f32
    %cst_60 = arith.constant 1.000000e-10 : f32
    %193 = arith.addf %192, %cst_60 : f32
    %194 = arith.divf %189, %193 : f32
    %cst_61 = arith.constant 0.000000e+00 : f32
    %195 = arith.addf %cst_61, %194 : f32
    %196 = arith.mulf %39, %109 : vector<64x64xf32>
    %197 = vector.shape_cast %196 : vector<64x64xf32> to vector<1x64x64xf32>
    %cst_62 = arith.constant dense<0.000000e+00> : vector<1xf32>
    %198 = vector.multi_reduction <add>, %197, %cst_62 [1, 2] : vector<1x64x64xf32> to vector<1xf32>
    %199 = vector.shape_cast %198 : vector<1xf32> to vector<1x1x1xf32>
    %200 = vector.extract %199[0, 0, 0] : f32 from vector<1x1x1xf32>
    %cst_63 = arith.constant 2.44140625E-4 : f32
    %201 = arith.mulf %200, %cst_63 : f32
    %cst_64 = arith.constant 0.000000e+00 : f32
    %202 = arith.maximumf %201, %cst_64 : f32
    %cst_65 = arith.constant 9.99999993E-9 : f32
    %203 = arith.addf %202, %cst_65 : f32
    %204 = math.sqrt %203 : f32
    %205 = arith.mulf %153, %171 : f32
    %cst_66 = arith.constant 0.000000e+00 : f32
    %206 = arith.maximumf %205, %cst_66 : f32
    %207 = math.sqrt %206 : f32
    %cst_67 = arith.constant 1.000000e-10 : f32
    %208 = arith.addf %207, %cst_67 : f32
    %209 = arith.divf %204, %208 : f32
    %210 = arith.addf %195, %209 : f32
    %211 = arith.mulf %39, %144 : vector<64x64xf32>
    %212 = vector.shape_cast %211 : vector<64x64xf32> to vector<1x64x64xf32>
    %cst_68 = arith.constant dense<0.000000e+00> : vector<1xf32>
    %213 = vector.multi_reduction <add>, %212, %cst_68 [1, 2] : vector<1x64x64xf32> to vector<1xf32>
    %214 = vector.shape_cast %213 : vector<1xf32> to vector<1x1x1xf32>
    %215 = vector.extract %214[0, 0, 0] : f32 from vector<1x1x1xf32>
    %cst_69 = arith.constant 2.44140625E-4 : f32
    %216 = arith.mulf %215, %cst_69 : f32
    %cst_70 = arith.constant 0.000000e+00 : f32
    %217 = arith.maximumf %216, %cst_70 : f32
    %cst_71 = arith.constant 9.99999993E-9 : f32
    %218 = arith.addf %217, %cst_71 : f32
    %219 = math.sqrt %218 : f32
    %220 = arith.mulf %153, %180 : f32
    %cst_72 = arith.constant 0.000000e+00 : f32
    %221 = arith.maximumf %220, %cst_72 : f32
    %222 = math.sqrt %221 : f32
    %cst_73 = arith.constant 1.000000e-10 : f32
    %223 = arith.addf %222, %cst_73 : f32
    %224 = arith.divf %219, %223 : f32
    %225 = arith.addf %210, %224 : f32
    %226 = arith.mulf %74, %109 : vector<64x64xf32>
    %227 = vector.shape_cast %226 : vector<64x64xf32> to vector<1x64x64xf32>
    %cst_74 = arith.constant dense<0.000000e+00> : vector<1xf32>
    %228 = vector.multi_reduction <add>, %227, %cst_74 [1, 2] : vector<1x64x64xf32> to vector<1xf32>
    %229 = vector.shape_cast %228 : vector<1xf32> to vector<1x1x1xf32>
    %230 = vector.extract %229[0, 0, 0] : f32 from vector<1x1x1xf32>
    %cst_75 = arith.constant 2.44140625E-4 : f32
    %231 = arith.mulf %230, %cst_75 : f32
    %cst_76 = arith.constant 0.000000e+00 : f32
    %232 = arith.maximumf %231, %cst_76 : f32
    %cst_77 = arith.constant 9.99999993E-9 : f32
    %233 = arith.addf %232, %cst_77 : f32
    %234 = math.sqrt %233 : f32
    %235 = arith.mulf %162, %171 : f32
    %cst_78 = arith.constant 0.000000e+00 : f32
    %236 = arith.maximumf %235, %cst_78 : f32
    %237 = math.sqrt %236 : f32
    %cst_79 = arith.constant 1.000000e-10 : f32
    %238 = arith.addf %237, %cst_79 : f32
    %239 = arith.divf %234, %238 : f32
    %240 = arith.addf %225, %239 : f32
    %241 = arith.mulf %74, %144 : vector<64x64xf32>
    %242 = vector.shape_cast %241 : vector<64x64xf32> to vector<1x64x64xf32>
    %cst_80 = arith.constant dense<0.000000e+00> : vector<1xf32>
    %243 = vector.multi_reduction <add>, %242, %cst_80 [1, 2] : vector<1x64x64xf32> to vector<1xf32>
    %244 = vector.shape_cast %243 : vector<1xf32> to vector<1x1x1xf32>
    %245 = vector.extract %244[0, 0, 0] : f32 from vector<1x1x1xf32>
    %cst_81 = arith.constant 2.44140625E-4 : f32
    %246 = arith.mulf %245, %cst_81 : f32
    %cst_82 = arith.constant 0.000000e+00 : f32
    %247 = arith.maximumf %246, %cst_82 : f32
    %cst_83 = arith.constant 9.99999993E-9 : f32
    %248 = arith.addf %247, %cst_83 : f32
    %249 = math.sqrt %248 : f32
    %250 = arith.mulf %162, %180 : f32
    %cst_84 = arith.constant 0.000000e+00 : f32
    %251 = arith.maximumf %250, %cst_84 : f32
    %252 = math.sqrt %251 : f32
    %cst_85 = arith.constant 1.000000e-10 : f32
    %253 = arith.addf %252, %cst_85 : f32
    %254 = arith.divf %249, %253 : f32
    %255 = arith.addf %240, %254 : f32
    %256 = arith.mulf %109, %144 : vector<64x64xf32>
    %257 = vector.shape_cast %256 : vector<64x64xf32> to vector<1x64x64xf32>
    %cst_86 = arith.constant dense<0.000000e+00> : vector<1xf32>
    %258 = vector.multi_reduction <add>, %257, %cst_86 [1, 2] : vector<1x64x64xf32> to vector<1xf32>
    %259 = vector.shape_cast %258 : vector<1xf32> to vector<1x1x1xf32>
    %260 = vector.extract %259[0, 0, 0] : f32 from vector<1x1x1xf32>
    %cst_87 = arith.constant 2.44140625E-4 : f32
    %261 = arith.mulf %260, %cst_87 : f32
    %cst_88 = arith.constant 0.000000e+00 : f32
    %262 = arith.maximumf %261, %cst_88 : f32
    %cst_89 = arith.constant 9.99999993E-9 : f32
    %263 = arith.addf %262, %cst_89 : f32
    %264 = math.sqrt %263 : f32
    %265 = arith.mulf %171, %180 : f32
    %cst_90 = arith.constant 0.000000e+00 : f32
    %266 = arith.maximumf %265, %cst_90 : f32
    %267 = math.sqrt %266 : f32
    %cst_91 = arith.constant 1.000000e-10 : f32
    %268 = arith.addf %267, %cst_91 : f32
    %269 = arith.divf %264, %268 : f32
    %270 = arith.addf %255, %269 : f32
    %cst_92 = arith.constant 5.000000e-01 : f32
    %271 = arith.mulf %cst_92, %270 : f32
    %cst_93 = arith.constant 1.000000e+01 : f32
    %272 = arith.divf %271, %cst_93 : f32
    %c0_94 = arith.constant 0 : index
    %273 = memref.load %arg1[%c0_94] : memref<1xf32, #tpu.memory_space<smem>>
    memref.store %272, %arg1[%c0_94] : memref<1xf32, #tpu.memory_space<smem>>
    return
  }
}

</mosaic_0001>

<bundles_post_ra>
// kernel: tpu_custom_call.1
= control target key start
LH: loop header
LB: loop body
LE: loop exit
PB: predicated region body
PF: predicated region fallthrough
CT: control target
= control target key end

     0   :  { %vm41_vm0 = vcmask 64512   ;;  %s4279_s0 = inlined_call_operand.vmem [shape: f32[4,64,8], index: 0, kind: input, shape index: {}]   ;;  %s4280_s1 = inlined_call_operand.hbm [shape: f32[1], index: 1, kind: output, shape index: {}]  }
   0x1   :  { %v9_v0 = vld [vmem:[%s4279_s0] sm:$0xff]  ;;  %v2663_v1 = vld [vmem:[%s4279_s0 + $0x8] sm:$0xff]  ;;  %vm2671_vm1 = vmpackc.low %vm41_vm0, %vm41_vm0 }
   0x2   :  { %v17_v2 = vld [vmem:[%s4279_s0 + $0x40] sm:$0xff]  ;;  %v2354_v3 = vpack.c.bf16 %v2663_v1, %v9_v0  ;;  %v2678_v5 = vld [vmem:[%s4279_s0 + $0x48] sm:$0xff]  ;;  %v558_v6 = vmul.f32 %v9_v0, %v9_v0  ;;  %v2683_v7 = vld [vmem:[%s4279_s0 + $0x10] sm:$0xff]  ;;  %v559_v8 = vmul.f32 %v2663_v1, %v2663_v1  ;;  %2258 = vmatprep.mubr.msk.f32.mxu0 %vm41_vm0, %v9_v0 }
   0x3   :  { %v2378_v9 = vpack.c.bf16 %v2678_v5, %v17_v2  ;;  %v2692_v10 = vld [vmem:[%s4279_s0 + $0x18] sm:$0xff]  ;;  %v560_v11 = vmul.f32 %v2683_v7, %v2683_v7  ;;  %v2699_v12 = vld [vmem:[%s4279_s0 + $0x50] sm:$0xff]  ;;  %2286 = vmatprep.mubr.msk.f32.mxu1 %vm41_vm0, %v17_v2  ;;  %v2717_v17 = vld [vmem:[%s4279_s0 + $0x20] sm:$0xff] }
   0x4   :  { %v2704_v13 = vld [vmem:[%s4279_s0 + $0x58] sm:$0xff]  ;;  %2356 = vmatprep.subr.msk.bf16.mxu0 %vm2671_vm1, %v2354_v3  ;;  %v590_v14 = vsel %vm41_vm0, %v558_v6, 0.0  ;;  %v2360_v15 = vpack.c.bf16 %v2692_v10, %v2683_v7  ;;  %v561_v19 = vmul.f32 %v2692_v10, %v2692_v10  ;;  %v2727_v20 = vld [vmem:[%s4279_s0 + $0x28] sm:$0xff]  ;;  %v593_v21 = vsel %vm41_vm0, %v559_v8, 0.0  ;;  %v2741_v23 = vld [vmem:[%s4279_s0 + $0x30] sm:$0xff] }
   0x5   :  { %v2384_v16 = vpack.c.bf16 %v2704_v13, %v2699_v12  ;;  %2380 = vmatprep.subr.msk.bf16.mxu1 %vm2671_vm1, %v2378_v9  ;;  %591 = vadd.xlane.f32.xlu0 %v590_v14  ;;  %v596_v18 = vsel %vm41_vm0, %v560_v11, 0.0  ;;  %v562_v22 = vmul.f32 %v2717_v17, %v2717_v17  ;;  %v563_v25 = vmul.f32 %v2727_v20, %v2727_v20  ;;  %v2751_v26 = vld [vmem:[%s4279_s0 + $0x60] sm:$0xff]  ;;  %v2756_v27 = vld [vmem:[%s4279_s0 + $0x68] sm:$0xff]  ;;  %v2761_v28 = vld [vmem:[%s4279_s0 + $0x38] sm:$0xff] }
   0x6   :  { %2383 = vmatpush3.bf16.xpose.msk.msra.mxu1 %vm2671_vm1, %v2378_v9  ;;  %2359 = vmatpush3.bf16.xpose.msk.msra.mxu0 %vm2671_vm1, %v2354_v3  ;;  %v599_v24 = vsel %vm41_vm0, %v561_v19, 0.0  ;;  %v564_v30 = vmul.f32 %v2741_v23, %v2741_v23  ;;  %v2366_v31 = vpack.c.bf16 %v2727_v20, %v2717_v17  ;;  %v2390_v33 = vpack.c.bf16 %v2756_v27, %v2751_v26 }
   0x7   :  { %597 = vadd.xlane.f32.xlu1 %v596_v18  ;;  %2362 = vmatprep.subr.msk.bf16.mxu0 %vm2671_vm1, %v2360_v15  ;;  %v602_v29 = vsel %vm41_vm0, %v562_v22, 0.0  ;;  %v605_v32 = vsel %vm41_vm0, %v563_v25, 0.0  ;;  %v565_v34 = vmul.f32 %v2761_v28, %v2761_v28 }
   0x8   :  { %2386 = vmatprep.subr.msk.bf16.mxu1 %vm2671_vm1, %v2384_v16 }
   0x9   :  { %594 = vadd.xlane.f32.xlu0 %v593_v21 }
   0xb   :  { %600 = vadd.xlane.f32.xlu1 %v599_v24 }
   0xc   :  { %6 = vsyncpa [#allocation3], 0  ;;  %v608_v35 = vsel %vm41_vm0, %v564_v30, 0.0  ;;  %v566_v36 = vmul.f32 %v17_v2, %v17_v2  ;;  %v611_v37 = vsel %vm41_vm0, %v565_v34, 0.0  ;;  %v567_v38 = vmul.f32 %v2678_v5, %v2678_v5  ;;  %v2788_v39 = vld [vmem:[%s4279_s0 + $0x70] sm:$0xff]  ;;  %v2793_v40 = vld [vmem:[%s4279_s0 + $0x78] sm:$0xff] }
   0xd   :  { %603 = vadd.xlane.f32.xlu0 %v602_v29  ;;  %v568_v42 = vmul.f32 %v2699_v12, %v2699_v12  ;;  %v2372_v43 = vpack.c.bf16 %v2761_v28, %v2741_v23  ;;  %v2396_v45 = vpack.c.bf16 %v2793_v40, %v2788_v39  ;;  %v569_v46 = vmul.f32 %v2704_v13, %v2704_v13  ;;  %v2820_v50 = vld [vmem:[%s4279_s0 + $0xc0] sm:$0xff]  ;;  %v2825_v51 = vld [vmem:[%s4279_s0 + $0xc8] sm:$0xff]  ;;  %v2859_v62 = vld [vmem:[%s4279_s0 + $0xd0] sm:$0xff]  ;;  %s2645_s21 = smov 0.0  }
   0xe   :  { %2389 = vmatpush3.bf16.xpose.msk.msra.mxu1 %vm2671_vm1, %v2384_v16  ;;  %2365 = vmatpush3.bf16.xpose.msk.msra.mxu0 %vm2671_vm1, %v2360_v15  ;;  %v614_v41 = vsel %vm41_vm0, %v566_v36, 0.0  ;;  %v617_v44 = vsel %vm41_vm0, %v567_v38, 0.0  ;;  %v570_v48 = vmul.f32 %v2751_v26, %v2751_v26  ;;  %v571_v52 = vmul.f32 %v2756_v27, %v2756_v27  ;;  %v2837_v56 = vld [vmem:[%s4279_s0 + $0x80] sm:$0xff]  ;;  %v2842_v57 = vld [vmem:[%s4279_s0 + $0x88] sm:$0xff]  ;;  %v2864_v63 = vld [vmem:[%s4279_s0 + $0xd8] sm:$0xff] }
   0xf   :  { %606 = vadd.xlane.f32.xlu1 %v605_v32  ;;  %2368 = vmatprep.subr.msk.bf16.mxu0 %vm2671_vm1, %v2366_v31  ;;  %v620_v47 = vsel %vm41_vm0, %v568_v42, 0.0  ;;  %v623_v49 = vsel %vm41_vm0, %v569_v46, 0.0  ;;  %v572_v54 = vmul.f32 %v2788_v39, %v2788_v39  ;;  %v2426_v55 = vpack.c.bf16 %v2825_v51, %v2820_v50  ;;  %v2889_v11 = vld [vmem:[%s4279_s0 + $0x90] sm:$0xff]  ;;  %v2910_v14 = vld [vmem:[%s4279_s0 + $0xe8] sm:$0xff]  ;;  %v2959_v22 = vld [vmem:[%s4279_s0 + $0xf8] sm:$0xff] }
  0x10   :  { %2392 = vmatprep.subr.msk.bf16.mxu1 %vm2671_vm1, %v2390_v33  ;;  %v626_v53 = vsel %vm41_vm0, %v570_v48, 0.0  ;;  %v629_v58 = vsel %vm41_vm0, %v571_v52, 0.0  ;;  %v573_v59 = vmul.f32 %v2793_v40, %v2793_v40  ;;  %v2402_v60 = vpack.c.bf16 %v2842_v57, %v2837_v56  ;;  %v30_v19 = vld [vmem:[%s4279_s0 + $0xa8] sm:$0xff]  ;;  %v2954_v21 = vld [vmem:[%s4279_s0 + $0xf0] sm:$0xff] }
  0x11   :  { %609 = vadd.xlane.f32.xlu0 %v608_v35  ;;  %v632_v61 = vsel %vm41_vm0, %v572_v54, 0.0  ;;  %v574_v2 = vmul.f32 %v2837_v56, %v2837_v56  ;;  %v2432_v3 = vpack.c.bf16 %v2864_v63, %v2859_v62  ;;  %v583_v6 = vmul.f32 %v2825_v51, %v2825_v51 }
  0x12   :  { %v635_v0 = vsel %vm41_vm0, %v573_v59, 0.0  ;;  %v575_v9 = vmul.f32 %v2842_v57, %v2842_v57  ;;  %v576_v16 = vmul.f32 %v2889_v11, %v2889_v11  ;;  %v2444_v25 = vpack.c.bf16 %v2959_v22, %v2954_v21 }
  0x13   :  { %612 = vadd.xlane.f32.xlu1 %v611_v37  ;;  %v638_v8 = vsel %vm41_vm0, %v574_v2, 0.0  ;;  %v579_v29 = vmul.f32 %v30_v19, %v30_v19  ;;  %v582_v36 = vmul.f32 %v2820_v50, %v2820_v50  ;;  %v584_v38 = vmul.f32 %v2859_v62, %v2859_v62 }
  0x14   :  { %v641_v15 = vsel %vm41_vm0, %v575_v9, 0.0  ;;  %vm818_vm2 = vcmask 523264  }
  0x15   :  { %615 = vadd.xlane.f32.xlu0 %v614_v41  ;;  %v662_v37 = vsel %vm41_vm0, %v582_v36, 0.0  ;;  %v668_v4 = vsel %vm41_vm0, %v584_v38, 0.0 }
  0x16   :  { %2395 = vmatpush3.bf16.xpose.msk.msra.mxu1 %vm2671_vm1, %v2390_v33  ;;  %2371 = vmatpush3.bf16.xpose.msk.msra.mxu0 %vm2671_vm1, %v2366_v31  ;;  %v653_v31 = vsel %vm41_vm0, %v579_v29, 0.0  ;;  %v734_v29 = vlaneseq }
  0x17   :  { %618 = vadd.xlane.f32.xlu1 %v617_v44  ;;  %2374 = vmatprep.subr.msk.bf16.mxu0 %vm2671_vm1, %v2372_v43 }
  0x18   :  { %2398 = vmatprep.subr.msk.bf16.mxu1 %vm2671_vm1, %v2396_v45 }
  0x19   :  { %621 = vadd.xlane.f32.xlu0 %v620_v47 }
  0x1b   :  { %624 = vadd.xlane.f32.xlu1 %v623_v49 }
  0x1d   :  { %627 = vadd.xlane.f32.xlu0 %v626_v53 }
  0x1e   :  { %2401 = vmatpush3.bf16.xpose.msk.msra.mxu1 %vm2671_vm1, %v2396_v45  ;;  %2377 = vmatpush3.bf16.xpose.msk.msra.mxu0 %vm2671_vm1, %v2372_v43 }
  0x1f   :  { %2428 = vmatprep.subr.msk.bf16.mxu1 %vm2671_vm1, %v2426_v55  ;;  %630 = vadd.xlane.f32.xlu1 %v629_v58 }
  0x20   :  { %2404 = vmatprep.subr.msk.bf16.mxu0 %vm2671_vm1, %v2402_v60 }
  0x21   :  { %633 = vadd.xlane.f32.xlu0 %v632_v61 }
  0x23   :  { %636 = vadd.xlane.f32.xlu1 %v635_v0  ;;  %v585_v0 = vmul.f32 %v2864_v63, %v2864_v63 }
  0x25   :  { %2259 = vmatmul.mubr.msk.f32.vlgmr.msra.gmra.mrb[0].mxu0 %vm41_vm0, %v2663_v1  ;;  %2287 = vmatmul.mubr.msk.f32.vlgmr.msra.gmra.mrb[0].mxu1 %vm41_vm0, %v2678_v5  ;;  %v2894_v1 = vld [vmem:[%s4279_s0 + $0x98] sm:$0xff] }
  0x26   :  { %2431 = vmatpush3.bf16.xpose.msk.msra.mxu1 %vm2671_vm1, %v2426_v55  ;;  %2261 = vmatprep.mubr.msk.f32.mxu0 %vm41_vm0, %v2683_v7  ;;  %v2408_v5 = vpack.c.bf16 %v2894_v1, %v2889_v11  ;;  %v2905_v7 = vld [vmem:[%s4279_s0 + $0xe0] sm:$0xff] }
  0x27   :  { %2289 = vmatprep.mubr.msk.f32.mxu1 %vm41_vm0, %v2699_v12  ;;  %2434 = vmatprep.subr.msk.bf16.mxu1 %vm2671_vm1, %v2432_v3  ;;  %v665_v12 = vsel %vm41_vm0, %v583_v6, 0.0  ;;  %v2438_v18 = vpack.c.bf16 %v2910_v14, %v2905_v7  ;;  %v671_v6 = vsel %vm41_vm0, %v585_v0, 0.0 }
  0x28   :  { %639 = vadd.xlane.f32.xlu1 %v638_v8  ;;  %2407 = vmatpush3.bf16.xpose.msk.msra.mxu0 %vm2671_vm1, %v2402_v60  ;;  %v586_v8 = vmul.f32 %v2905_v7, %v2905_v7 }
  0x29   :  { %2262 = vmatmul.mubr.msk.f32.gmra.mrb[2].mxu0 %vm41_vm0, %v2692_v10  ;;  %2290 = vmatmul.mubr.msk.f32.gmra.mrb[2].mxu1 %vm41_vm0, %v2704_v13  ;;  %v644_v10 = vsel %vm41_vm0, %v576_v16, 0.0  ;;  %v577_v13 = vmul.f32 %v2894_v1, %v2894_v1 }
  0x2a   :  { %2264 = vmatprep.mubr.msk.f32.mxu0 %vm41_vm0, %v2717_v17  ;;  %2292 = vmatprep.mubr.msk.f32.mxu1 %vm41_vm0, %v2751_v26  ;;  %v29_v17 = vld [vmem:[%s4279_s0 + $0xa0] sm:$0xff]  ;;  %v31_v26 = vld [vmem:[%s4279_s0 + $0xb0] sm:$0xff]  ;;  %v674_v9 = vsel %vm41_vm0, %v586_v8, 0.0 }
  0x2b   :  { %2410 = vmatprep.subr.msk.bf16.mxu0 %vm2671_vm1, %v2408_v5  ;;  %666 = vadd.xlane.f32.xlu0 %v665_v12  ;;  %v578_v24 = vmul.f32 %v29_v17, %v29_v17  ;;  %v580_v32 = vmul.f32 %v31_v26, %v31_v26  ;;  %v589_v12 = vmul.f32 %v2959_v22, %v2959_v22 }
  0x2c   :  { %642 = vadd.xlane.f32.xlu1 %v641_v15 }
  0x2d   :  { %2265 = vmatmul.mubr.msk.f32.gmra.mrb[4].mxu0 %vm41_vm0, %v2727_v20  ;;  %2293 = vmatmul.mubr.msk.f32.gmra.mrb[4].mxu1 %vm41_vm0, %v2756_v27  ;;  %v2414_v20 = vpack.c.bf16 %v30_v19, %v29_v17  ;;  %v32_v27 = vld [vmem:[%s4279_s0 + $0xb8] sm:$0xff]  ;;  %v656_v33 = vsel %vm41_vm0, %v580_v32, 0.0  ;;  %v683_v15 = vsel %vm41_vm0, %v589_v12, 0.0 }
  0x2e   :  { %2437 = vmatpush3.bf16.xpose.msk.msra.mxu1 %vm2671_vm1, %v2432_v3  ;;  %2267 = vmatprep.mubr.msk.f32.mxu0 %vm41_vm0, %v2741_v23  ;;  %v647_v23 = vsel %vm41_vm0, %v577_v13, 0.0  ;;  %v2420_v30 = vpack.c.bf16 %v32_v27, %v31_v26  ;;  %v581_v34 = vmul.f32 %v32_v27, %v32_v27 }
  0x2f   :  { %2295 = vmatprep.mubr.msk.f32.mxu1 %vm41_vm0, %v2788_v39  ;;  %2440 = vmatprep.subr.msk.bf16.mxu1 %vm2671_vm1, %v2438_v18 }
  0x30   :  { %645 = vadd.xlane.f32.xlu1 %v644_v10  ;;  %2413 = vmatpush3.bf16.xpose.msk.msra.mxu0 %vm2671_vm1, %v2408_v5  ;;  %v659_v35 = vsel %vm41_vm0, %v581_v34, 0.0  ;;  %v588_v5 = vmul.f32 %v2954_v21, %v2954_v21 }
  0x31   :  { %2268 = vmatmul.mubr.msk.f32.gmra.mrb[6].mxu0 %vm41_vm0, %v2761_v28  ;;  %2296 = vmatmul.mubr.msk.f32.gmra.mrb[6].mxu1 %vm41_vm0, %v2793_v40  ;;  %v650_v28 = vsel %vm41_vm0, %v578_v24, 0.0 }
  0x32   :  { %2342 = vmatprep.mubr.msk.f32.mxu1 %vm41_vm0, %v2820_v50  ;;  %2416 = vmatprep.subr.msk.bf16.mxu0 %vm2671_vm1, %v2414_v20 }
  0x33   :  { %2314 = vmatprep.mubr.msk.f32.mxu0 %vm41_vm0, %v2837_v56 }
  0x34   :  { %648 = vadd.xlane.f32.xlu1 %v647_v23 }
  0x36   :  { %2443 = vmatpush3.bf16.xpose.msk.msra.mxu1 %vm2671_vm1, %v2438_v18 }
  0x37   :  { %2446 = vmatprep.subr.msk.bf16.mxu1 %vm2671_vm1, %v2444_v25 }
  0x38   :  { %651 = vadd.xlane.f32.xlu1 %v650_v28  ;;  %2419 = vmatpush3.bf16.xpose.msk.msra.mxu0 %vm2671_vm1, %v2414_v20 }
  0x39   :  { %2422 = vmatprep.subr.msk.bf16.mxu0 %vm2671_vm1, %v2420_v30 }
  0x3c   :  { %654 = vadd.xlane.f32.xlu1 %v653_v31 }
  0x3e   :  { %2449 = vmatpush3.bf16.xpose.msk.msra.mxu1 %vm2671_vm1, %v2444_v25 }
  0x40   :  { %657 = vadd.xlane.f32.xlu1 %v656_v33  ;;  %2425 = vmatpush3.bf16.xpose.msk.msra.mxu0 %vm2671_vm1, %v2420_v30  ;;  %v735_v30 = vshrl.u32 %v734_v29, 7 }
  0x44   :  { %660 = vadd.xlane.f32.xlu1 %v659_v35  ;;  %v3118_v35 = vsub.s32 0, %v735_v30 }
  0x45   :  { %2343 = vmatmul.mubr.msk.f32.vlgmr.msra.gmra.mrb[8].mxu1 %vm41_vm0, %v2825_v51 }
  0x46   :  { %2345 = vmatprep.mubr.msk.f32.mxu1 %vm41_vm0, %v2859_v62 }
  0x47   :  { %2315 = vmatmul.mubr.msk.f32.vlgmr.msra.gmra.mrb[8].mxu0 %vm41_vm0, %v2842_v57 }
  0x48   :  { %663 = vadd.xlane.f32.xlu1 %v662_v37  ;;  %2317 = vmatprep.mubr.msk.f32.mxu0 %vm41_vm0, %v2889_v11  ;;  %v587_v11 = vmul.f32 %v2910_v14, %v2910_v14 }
  0x49   :  { %2346 = vmatmul.mubr.msk.f32.gmra.mrb[10].mxu1 %vm41_vm0, %v2864_v63 }
  0x4a   :  { %2348 = vmatprep.mubr.msk.f32.mxu1 %vm41_vm0, %v2905_v7  ;;  %v680_v7 = vsel %vm41_vm0, %v588_v5, 0.0 }
  0x4b   :  { %2318 = vmatmul.mubr.msk.f32.gmra.mrb[10].mxu0 %vm41_vm0, %v2894_v1  ;;  %v677_v1 = vsel %vm41_vm0, %v587_v11, 0.0 }
  0x4c   :  { %669 = vadd.xlane.f32.xlu1 %v668_v4  ;;  %2320 = vmatprep.mubr.msk.f32.mxu0 %vm41_vm0, %v29_v17 }
  0x4d   :  { %2349 = vmatmul.mubr.msk.f32.gmra.mrb[12].mxu1 %vm41_vm0, %v2910_v14 }
  0x4e   :  { %2351 = vmatprep.mubr.msk.f32.mxu1 %vm41_vm0, %v2954_v21 }
  0x4f   :  { %2321 = vmatmul.mubr.msk.f32.gmra.mrb[12].mxu0 %vm41_vm0, %v30_v19 }
  0x50   :  { %2323 = vmatprep.mubr.msk.f32.mxu0 %vm41_vm0, %v31_v26 }
  0x51   :  { %2352 = vmatmul.mubr.msk.f32.gmra.mrb[14].mxu1 %vm41_vm0, %v2959_v22 }
  0x53   :  { %2324 = vmatmul.mubr.msk.f32.gmra.mrb[14].mxu0 %vm41_vm0, %v32_v27 }
  0x92   :  { %v3028_v39 = vpop.xlane.xlu0 %591 }
  0x93   :  { %702 = vxpose.xlu0.b32.start [1/8] (short) (narrow) %v3028_v39, 8 }
  0x94   :  { %v3031_v40 = vpop.xlane.xlu1 %597 }
  0x96   :  { %v3033_v41 = vpop.xlane.xlu0 %594 }
  0x97   :  { %703 = vxpose.xlu0.b32.cont [2/8] (short) (narrow) %v3033_v41, 8 }
  0x98   :  { %v3036_v42 = vpop.xlane.xlu1 %600 }
  0x9a   :  { %v3038_v43 = vpop.xlane.xlu0 %603 }
  0x9b   :  { %704 = vxpose.xlu0.b32.cont [3/8] (short) (narrow) %v3031_v40, 8 }
  0x9c   :  { %v3041_v44 = vpop.xlane.xlu1 %606 }
  0x9e   :  { %v3043_v45 = vpop.xlane.xlu0 %609 }
  0x9f   :  { %705 = vxpose.xlu0.b32.cont [4/8] (short) (narrow) %v3036_v42, 8 }
  0xa0   :  { %v3046_v46 = vpop.xlane.xlu1 %612 }
  0xa2   :  { %v3048_v47 = vpop.xlane.xlu0 %615 }
  0xa3   :  { %706 = vxpose.xlu0.b32.cont [5/8] (short) (narrow) %v3038_v43, 8  ;;  %921 = vxpose.xlu1.b32.start [1/8] (short) (narrow) %v3048_v47, 8 }
  0xa4   :  { %v3052_v48 = vpop.xlane.xlu1 %618 }
  0xa6   :  { %v3056_v49 = vpop.xlane.xlu0 %621 }
  0xa7   :  { %707 = vxpose.xlu0.b32.cont [6/8] (short) (narrow) %v3041_v44, 8  ;;  %922 = vxpose.xlu1.b32.cont [2/8] (short) (narrow) %v3052_v48, 8 }
  0xa8   :  { %v3058_v50 = vpop.xlane.xlu1 %624 }
  0xaa   :  { %v3066_v52 = vpop.xlane.xlu0 %627 }
  0xab   :  { %708 = vxpose.xlu0.b32.cont [7/8] (short) (narrow) %v3043_v45, 8  ;;  %923 = vxpose.xlu1.b32.cont [3/8] (short) (narrow) %v3056_v49, 8 }
  0xac   :  { %v3062_v51 = vpop.xlane.xlu1 %630 }
  0xae   :  { %v3074_v55 = vpop.xlane.xlu0 %633 }
  0xaf   :  { %709 = vxpose.xlu0.b32.end [8/8] (short) (narrow) %v3046_v46, 8  ;;  %924 = vxpose.xlu1.b32.cont [4/8] (short) (narrow) %v3058_v50, 8 }
  0xb0   :  { %v3068_v53 = vpop.xlane.xlu1 %636 }
  0xb3   :  { %925 = vxpose.xlu1.b32.cont [5/8] (short) (narrow) %v3066_v52, 8 }
  0xb5   :  { %v3071_v54 = vpop.xlane.xlu1 %639 }
  0xb7   :  { %926 = vxpose.xlu1.b32.cont [6/8] (short) (narrow) %v3062_v51, 8 }
  0xb8   :  { %v3097_v3 = vpop.xlane.xlu0 %666 }
  0xb9   :  { %v3076_v56 = vpop.xlane.xlu1 %642 }
  0xbb   :  { %927 = vxpose.xlu1.b32.cont [7/8] (short) (narrow) %v3074_v55, 8 }
  0xbd   :  { %v3079_v57 = vpop.xlane.xlu1 %645 }
  0xbf   :  { %928 = vxpose.xlu1.b32.end [8/8] (short) (narrow) %v3068_v53, 8 }
  0xc1   :  { %v3082_v58 = vpop.xlane.xlu1 %648 }
  0xc5   :  { %v3084_v59 = vpop.xlane.xlu1 %651 }
  0xc9   :  { %v3086_v60 = vpop.xlane.xlu1 %654 }
  0xcd   :  { %v3088_v61 = vpop.xlane.xlu1 %657 }
  0xd1   :  { %v3090_v62 = vpop.xlane.xlu1 %660 }
  0xd5   :  { %v3094_v2 = vpop.xlane.xlu1 %663 }
  0xd6   :  { %1353 = vxpose.xlu1.b32.start [1/8] (short) (narrow) %v3094_v2, 8 }
  0xd9   :  { %v3106_v63 = vpop.xlane.xlu1 %669 }
  0xda   :  { %1354 = vxpose.xlu1.b32.cont [2/8] (short) (narrow) %v3097_v3, 8 }
  0xdc   :  { %672 = vadd.xlane.f32.xlu0 %v671_v6 }
  0xde   :  { %1355 = vxpose.xlu1.b32.cont [3/8] (short) (narrow) %v3106_v63, 8 }
  0xe0   :  { %675 = vadd.xlane.f32.xlu0 %v674_v9 }
  0xe4   :  { %678 = vadd.xlane.f32.xlu0 %v677_v1 }
  0xe8   :  { %681 = vadd.xlane.f32.xlu0 %v680_v7 }
  0xec   :  { %684 = vadd.xlane.f32.xlu0 %v683_v15 }
  0xf8   :  { %v2260_v14 = vpop.f32.mrb[0].mxu0  ;;  %v3116_v16 = vpop.f32.mrb[0].mxu1 }
  0xf9   :  { %v132_v18 = vpop.f32.mrb[1].mxu0  ;;  %v261_v10 = vpop.f32.mrb[1].mxu1  ;;  %v687_v31 = vmul.f32 2.0, %v2260_v14 }
  0xfa   :  { %v686_v32 = vmul.f32 2.0, %v132_v18 }
  0xfb   :  { %v695_v36 = vsub.f32 %v3033_v41, %v687_v31 }
  0xfc   :  { %v2263_v13 = vpop.f32.mrb[2].mxu0  ;;  %v2291_v17 = vpop.f32.mrb[2].mxu1  ;;  %v694_v4 = vsub.f32 %v3028_v39, %v686_v32 }
  0xfd   :  { %v142_v19 = vpop.f32.mrb[3].mxu0  ;;  %v271_v20 = vpop.f32.mrb[3].mxu1  ;;  %v689_v33 = vmul.f32 2.0, %v2263_v13 }
  0xfe   :  { %v688_v34 = vmul.f32 2.0, %v142_v19 }
  0xff   :  { %v697_v0 = vsub.f32 %v3036_v42, %v689_v33 }
 0x100   :  { %v2266_v21 = vpop.f32.mrb[4].mxu0  ;;  %v2294_v23 = vpop.f32.mrb[4].mxu1  ;;  %v696_v6 = vsub.f32 %v3031_v40, %v688_v34 }
 0x101   :  { %v152_v24 = vpop.f32.mrb[5].mxu0  ;;  %v281_v25 = vpop.f32.mrb[5].mxu1  ;;  %v691_v7 = vmul.f32 2.0, %v2266_v21 }
 0x102   :  { %v690_v37 = vmul.f32 2.0, %v152_v24 }
 0x103   :  { %v699_v30 = vsub.f32 %v3041_v44, %v691_v7 }
 0x104   :  { %v2269_v26 = vpop.f32.mrb[6].mxu0  ;;  %v2297_v27 = vpop.f32.mrb[6].mxu1  ;;  %v698_v12 = vsub.f32 %v3038_v43, %v690_v37 }
 0x105   :  { %v162_v22 = vpop.f32.mrb[7].mxu0  ;;  %v291_v28 = vpop.f32.mrb[7].mxu1  ;;  %v693_v39 = vmul.f32 2.0, %v2269_v26 }
 0x106   :  { %v692_v15 = vmul.f32 2.0, %v162_v22 }
 0x107   :  { %v701_v26 = vsub.f32 %v3046_v46, %v693_v39  ;;  %v906_v46 = vmul.f32 2.0, %v3116_v16 }
 0x108   :  { %v700_v43 = vsub.f32 %v3043_v45, %v692_v15 }
 0x113   :  { %v718_v38 = vpop.trf.xlu0 }
 0x114   :  { %v737_v8 = vrot.slane %v718_v38, %v3118_v35 }
 0x116   :  { %v738_v9 = vadd.f32 %v737_v8, %v694_v4  ;;  %v739_v11 = vadd.f32 %v737_v8, %v695_v36  ;;  %v740_v1 = vadd.f32 %v737_v8, %v696_v6  ;;  %v741_v5 = vadd.f32 %v737_v8, %v697_v0 }
 0x117   :  { %v742_v19 = vadd.f32 %v737_v8, %v698_v12  ;;  %v743_v31 = vadd.f32 %v737_v8, %v699_v30  ;;  %v744_v36 = vadd.f32 %v737_v8, %v700_v43  ;;  %v745_v38 = vadd.f32 %v737_v8, %v701_v26 }
 0x118   :  { %v746_v14 = vmax.f32 %v738_v9, 0.0  ;;  %v747_v41 = vmax.f32 %v739_v11, 0.0  ;;  %v748_v18 = vmax.f32 %v740_v1, 0.0  ;;  %v3126_v13 = vpop.f32.mrb[8].mxu1  ;;  %v749_v40 = vmax.f32 %v741_v5, 0.0 }
 0x119   :  { %v3128_v42 = vpop.f32.mrb[9].mxu1  ;;  %v750_v32 = vmax.f32 %v742_v19, 0.0  ;;  %v905_v0 = vmul.f32 2.0, %v261_v10  ;;  %v908_v6 = vmul.f32 2.0, %v2291_v17  ;;  %v907_v9 = vmul.f32 2.0, %v271_v20 }
 0x11a   :  { %v3130_v24 = vadd.f32 1e-08, %v746_v14  ;;  %v3132_v29 = vadd.f32 1e-08, %v747_v41  ;;  %v3135_v21 = vadd.f32 1e-08, %v748_v18  ;;  %v914_v20 = vsub.f32 %v3052_v48, %v906_v46 }
 0x11b   :  { %v3139_v22 = vpop.f32.mrb[8].mxu0  ;;  %v3147_v44 = vadd.f32 1e-08, %v749_v40  ;;  %v910_v1 = vmul.f32 2.0, %v2294_v23  ;;  %v909_v5 = vmul.f32 2.0, %v281_v25  ;;  %v751_v7 = vmax.f32 %v743_v31, 0.0 }
 0x11c   :  { %2525 = vrsqrt.f32 %v3130_v24  ;;  %4287 = vst [vmem:[#allocation5_spill] sm:$0xff] %v3139_v22  ;;  %v3143_v33 = vpop.f32.mrb[9].mxu0  ;;  %v3145_v34 = vpop.f32.mrb[10].mxu1  ;;  %v3159_v12 = vadd.f32 1e-08, %v750_v32  ;;  %v3163_v14 = vmul.f32 2.0, %v2297_v27  ;;  %v913_v23 = vsub.f32 %v3048_v47, %v905_v0 }
 0x11d   :  { %2527 = vrsqrt.f32 %v3132_v29  ;;  %4288 = vst [vmem:[#allocation6_spill] sm:$0xff] %v3143_v33  ;;  %v3151_v45 = vpop.f32.mrb[11].mxu1  ;;  %v911_v8 = vmul.f32 2.0, %v291_v28  ;;  %v752_v41 = vmax.f32 %v744_v36, 0.0  ;;  %v753_v16 = vmax.f32 %v745_v38, 0.0 }
 0x11e   :  { %v3149_v37 = vpop.f32.mrb[10].mxu0  ;;  %2529 = vrsqrt.f32 %v3135_v21  ;;  %v916_v25 = vsub.f32 %v3058_v50, %v908_v6  ;;  %v915_v28 = vsub.f32 %v3056_v49, %v907_v9  ;;  %v918_v19 = vsub.f32 %v3062_v51, %v910_v1 }
 0x11f   :  { %4289 = vst [vmem:[#allocation7_spill] sm:$0xff] %v3149_v37  ;;  %v3154_v4 = vpop.f32.mrb[11].mxu0  ;;  %2531 = vrsqrt.f32 %v3147_v44  ;;  %v3178_v40 = vadd.f32 1e-08, %v751_v7  ;;  %v917_v47 = vsub.f32 %v3066_v52, %v909_v5  ;;  %v920_v50 = vsub.f32 %v3068_v53, %v3163_v14 }
 0x120   :  { %4290 = vst [vmem:[#allocation8_spill] sm:$0xff] %v3154_v4  ;;  %v3157_v11 = vpop.f32.mrb[12].mxu1  ;;  %2533 = vrsqrt.f32 %v3159_v12  ;;  %v919_v43 = vsub.f32 %v3074_v55, %v911_v8  ;;  %v3187_v26 = vadd.f32 1e-08, %v752_v41  ;;  %v3191_v31 = vadd.f32 1e-08, %v753_v16 }
 0x121   :  { %v3161_v15 = vpop.f32.mrb[13].mxu1  ;;  %vm764_vm3 = vcmp.eq.f32.partialorder %v3130_v24, inf  ;;  %vm766_vm4 = vcmp.eq.f32.partialorder %v3130_v24, 0.0  ;;  %v767_v52 = vand.u32 2147483648, %v3130_v24  ;;  %vm771_vm5 = vcmp.eq.f32.partialorder %v3132_v29, inf }
 0x122   :  { %v3166_v18 = vpop.f32.mrb[12].mxu0  ;;  %vm773_vm6 = vcmp.eq.f32.partialorder %v3132_v29, 0.0  ;;  %2535 = vrsqrt.f32 %v3178_v40  ;;  %v774_v5 = vand.u32 2147483648, %v3132_v29  ;;  %vm778_vm7 = vcmp.eq.f32.partialorder %v3135_v21, inf }
 0x123   :  { %4291 = vst [vmem:[#allocation9_spill] sm:$0xff] %v3166_v18  ;;  %v937_v10 = vpop.trf.xlu1  ;;  %v3168_v17 = vpop.f32.mrb[13].mxu0  ;;  %2537 = vrsqrt.f32 %v3187_v26  ;;  %vm780_vm8 = vcmp.eq.f32.partialorder %v3135_v21, 0.0  ;;  %vm785_vm9 = vcmp.eq.f32.partialorder %v3147_v44, inf  ;;  %vm787_vm10 = vcmp.eq.f32.partialorder %v3147_v44, 0.0 }
 0x124   :  { %4292 = vst [vmem:[#allocation10_spill] sm:$0xff] %v3168_v17  ;;  %v956_v39 = vrot.slane %v937_v10, %v3118_v35  ;;  %v3174_v27 = vpop.f32.mrb[14].mxu1  ;;  %2539 = vrsqrt.f32 %v3191_v31  ;;  %vm792_vm11 = vcmp.eq.f32.partialorder %v3159_v12, inf  ;;  %vm794_vm12 = vcmp.eq.f32.partialorder %v3159_v12, 0.0 }
 0x125   :  { %v3181_v30 = vpop.f32.mrb[15].mxu1  ;;  %vm799_vm13 = vcmp.eq.f32.partialorder %v3178_v40, inf  ;;  %vm801_vm14 = vcmp.eq.f32.partialorder %v3178_v40, 0.0  ;;  %vm806_vm15 = vcmp.eq.f32.partialorder %v3187_v26, inf  ;;  %vm808_vm0 = vcmp.eq.f32.partialorder %v3187_v26, 0.0 }
 0x126   :  { %v2526_v48 = vpop.eup %2525  ;;  %v3189_v49 = vpop.f32.mrb[14].mxu0  ;;  %v957_v55 = vadd.f32 %v956_v39, %v913_v23  ;;  %v958_v46 = vadd.f32 %v956_v39, %v914_v20  ;;  %v959_v0 = vadd.f32 %v956_v39, %v915_v28  ;;  %v960_v1 = vadd.f32 %v956_v39, %v916_v25 }
 0x127   :  { %4293 = vst [vmem:[#allocation11_spill] sm:$0xff] %v3189_v49  ;;  %v2528_v51 = vpop.eup %2527  ;;  %v763_v32 = vmul.f32 %v2526_v48, %v3130_v24  ;;  %v3196_v36 = vpop.f32.mrb[15].mxu0  ;;  %v961_v7 = vadd.f32 %v956_v39, %v917_v47  ;;  %v962_v41 = vadd.f32 %v956_v39, %v918_v19  ;;  %v963_v16 = vadd.f32 %v956_v39, %v919_v43 }
 0x128   :  { %4294 = vst [vmem:[#allocation12_spill] sm:$0xff] %v3196_v36  ;;  %v770_v53 = vmul.f32 %v2528_v51, %v3132_v29  ;;  %v2530_v38 = vpop.eup %2529  ;;  %v965_v10 = vmax.f32 %v957_v55, 0.0  ;;  %v966_v25 = vmax.f32 %v958_v46, 0.0  ;;  %v967_v28 = vmax.f32 %v959_v0, 0.0 }
 0x129   :  { %v765_v6 = vsel %vm764_vm3, %v3130_v24, %v763_v32  ;;  %v2532_v14 = vpop.eup %2531  ;;  %v777_v8 = vmul.f32 %v2530_v38, %v3135_v21  ;;  %v781_v48 = vand.u32 2147483648, %v3135_v21  ;;  %v968_v47 = vmax.f32 %v960_v1, 0.0 }
 0x12a   :  { %v772_v9 = vsel %vm771_vm5, %v3132_v29, %v770_v53  ;;  %v3212_v20 = vsel %vm766_vm4, %v767_v52, %v765_v6  ;;  %v2534_v19 = vpop.eup %2533  ;;  %v784_v43 = vmul.f32 %v2532_v14, %v3147_v44  ;;  %v788_v24 = vand.u32 2147483648, %v3147_v44 }
 0x12b   :  { %v3216_v23 = vsel %vm773_vm6, %v774_v5, %v772_v9  ;;  %v964_v51 = vadd.f32 %v956_v39, %v920_v50  ;;  %v969_v29 = vmax.f32 %v961_v7, 0.0  ;;  %v3226_v32 = vsel %vm818_vm2, %v3212_v20, 0.0 }
 0x12c   :  { %v3230_v52 = vsel %vm818_vm2, %v3216_v23, 0.0  ;;  %v970_v53 = vmax.f32 %v962_v41, 0.0  ;;  %v971_v55 = vmax.f32 %v963_v16, 0.0  ;;  %v779_v38 = vsel %vm778_vm7, %v3135_v21, %v777_v8  ;;  %v2536_v9 = vpop.eup %2535 }
 0x12d   :  { %v3235_v46 = vadd.f32 1e-08, %v965_v10  ;;  %v3237_v0 = vadd.f32 1e-08, %v966_v25  ;;  %v3239_v39 = vadd.f32 1e-08, %v967_v28  ;;  %v791_v50 = vmul.f32 %v2534_v19, %v3159_v12  ;;  %v2538_v14 = vpop.eup %2537 }
 0x12e   :  { %v3244_v6 = vadd.f32 1e-08, %v968_v47  ;;  %v795_v1 = vand.u32 2147483648, %v3159_v12  ;;  %v972_v5 = vmax.f32 %v964_v51, 0.0  ;;  %v3247_v7 = vadd.f32 1e-08, %v969_v29  ;;  %v2540_v10 = vpop.eup %2539 }
 0x12f   :  { %2541 = vrsqrt.f32 %v3235_v46  ;;  %v3252_v8 = vsel %vm780_vm8, %v781_v48, %v779_v38  ;;  %v821_v41 = vadd.f32 %v3230_v52, %v3226_v32  ;;  %v3256_v16 = vadd.f32 1e-08, %v970_v53 }
 0x130   :  { %2543 = vrsqrt.f32 %v3237_v0  ;;  %v786_v25 = vsel %vm785_vm9, %v3147_v44, %v784_v43  ;;  %v3263_v28 = vadd.f32 1e-08, %v971_v55  ;;  %v793_v21 = vsel %vm792_vm11, %v3159_v12, %v791_v50 }
 0x131   :  { %2545 = vrsqrt.f32 %v3239_v39  ;;  %v798_v48 = vmul.f32 %v2536_v9, %v3178_v40  ;;  %v805_v47 = vmul.f32 %v2538_v14, %v3187_v26  ;;  %v3275_v19 = vsel %vm818_vm2, %v3252_v8, 0.0 }
 0x132   :  { %2547 = vrsqrt.f32 %v3244_v6  ;;  %v3277_v43 = vadd.f32 1e-08, %v972_v5  ;;  %v3282_v51 = vsel %vm787_vm10, %v788_v24, %v786_v25  ;;  %v812_v29 = vmul.f32 %v2540_v10, %v3191_v31 }
 0x133   :  { %2549 = vrsqrt.f32 %v3247_v7  ;;  %v823_v53 = vadd.f32 %v3275_v19, %v821_v41  ;;  %v802_v55 = vand.u32 2147483648, %v3178_v40  ;;  %v3293_v38 = vsel %vm794_vm12, %v795_v1, %v793_v21 }
 0x134   :  { %2551 = vrsqrt.f32 %v3256_v16  ;;  %v800_v44 = vsel %vm799_vm13, %v3178_v40, %v798_v48  ;;  %v809_v24 = vand.u32 2147483648, %v3187_v26  ;;  %vm813_vm1 = vcmp.eq.f32.partialorder %v3191_v31, inf }
 0x135   :  { %2553 = vrsqrt.f32 %v3263_v28  ;;  %v807_v50 = vsel %vm806_vm15, %v3187_v26, %v805_v47  ;;  %vm815_vm3 = vcmp.eq.f32.partialorder %v3191_v31, 0.0  ;;  %v816_v9 = vand.u32 2147483648, %v3191_v31 }
 0x136   :  { %v3305_v5 = vsel %vm818_vm2, %v3282_v51, 0.0  ;;  %2555 = vrsqrt.f32 %v3277_v43  ;;  %v814_v12 = vsel %vm813_vm1, %v3191_v31, %v812_v29  ;;  %vm983_vm4 = vcmp.eq.f32.partialorder %v3235_v46, inf }
 0x137   :  { %vm985_vm5 = vcmp.eq.f32.partialorder %v3235_v46, 0.0  ;;  %v825_v1 = vadd.f32 %v3305_v5, %v823_v53  ;;  %v986_v41 = vand.u32 2147483648, %v3235_v46  ;;  %vm990_vm6 = vcmp.eq.f32.partialorder %v3237_v0, inf }
 0x138   :  { %v3316_v10 = vsel %vm801_vm14, %v802_v55, %v800_v44  ;;  %v3320_v25 = vsel %vm818_vm2, %v3293_v38, 0.0  ;;  %vm992_vm7 = vcmp.eq.f32.partialorder %v3237_v0, 0.0  ;;  %v993_v47 = vand.u32 2147483648, %v3237_v0 }
 0x139   :  { %v2542_v14 = vpop.eup %2541  ;;  %v827_v29 = vadd.f32 %v3320_v25, %v825_v1  ;;  %vm997_vm8 = vcmp.eq.f32.partialorder %v3239_v39, inf  ;;  %vm999_vm9 = vcmp.eq.f32.partialorder %v3239_v39, 0.0  ;;  %v1000_v40 = vand.u32 2147483648, %v3239_v39 }
 0x13a   :  { %v2544_v21 = vpop.eup %2543  ;;  %v982_v48 = vmul.f32 %v2542_v14, %v3235_v46  ;;  %v3336_v49 = vsel %vm808_vm0, %v809_v24, %v807_v50  ;;  %v3340_v1 = vsel %vm818_vm2, %v3316_v10, 0.0  ;;  %vm1004_vm10 = vcmp.eq.f32.partialorder %v3244_v6, inf }
 0x13b   :  { %v2546_v53 = vpop.eup %2545  ;;  %v989_v36 = vmul.f32 %v2544_v21, %v3237_v0  ;;  %vm1006_vm11 = vcmp.eq.f32.partialorder %v3244_v6, 0.0  ;;  %vm1011_vm12 = vcmp.eq.f32.partialorder %v3247_v7, inf  ;;  %vm1018_vm13 = vcmp.eq.f32.partialorder %v3256_v16, inf }
 0x13c   :  { %v2548_v55 = vpop.eup %2547  ;;  %v984_v44 = vsel %vm983_vm4, %v3235_v46, %v982_v48  ;;  %v996_v14 = vmul.f32 %v2546_v53, %v3239_v39  ;;  %v829_v53 = vadd.f32 %v3340_v1, %v827_v29  ;;  %vm1013_vm14 = vcmp.eq.f32.partialorder %v3247_v7, 0.0 }
 0x13d   :  { %v2550_v21 = vpop.eup %2549  ;;  %v3344_v17 = vsel %vm985_vm5, %v986_v41, %v984_v44  ;;  %v991_v18 = vsel %vm990_vm6, %v3237_v0, %v989_v36  ;;  %v1003_v48 = vmul.f32 %v2548_v55, %v3244_v6  ;;  %v1007_v55 = vand.u32 2147483648, %v3244_v6 }
 0x13e   :  { %v2552_v26 = vpop.eup %2551  ;;  %v3353_v24 = vsel %vm992_vm7, %v993_v47, %v991_v18  ;;  %v998_v50 = vsel %vm997_vm8, %v3239_v39, %v996_v14  ;;  %v1010_v4 = vmul.f32 %v2550_v21, %v3247_v7  ;;  %v3359_v46 = vsel %vm818_vm2, %v3344_v17, 0.0 }
 0x13f   :  { %v2554_v41 = vpop.eup %2553  ;;  %v3363_v36 = vsel %vm999_vm9, %v1000_v40, %v998_v50  ;;  %v3369_v18 = vsel %vm818_vm2, %v3353_v24, 0.0  ;;  %v1005_v0 = vsel %vm1004_vm10, %v3244_v6, %v1003_v48  ;;  %v1017_v47 = vmul.f32 %v2552_v26, %v3256_v16 }
 0x140   :  { %v1039_v29 = vadd.f32 %v3369_v18, %v3359_v46  ;;  %v3377_v39 = vsel %vm815_vm3, %v816_v9, %v814_v12  ;;  %v2556_v40 = vpop.eup %2555  ;;  %v3383_v44 = vsel %vm818_vm2, %v3363_v36, 0.0  ;;  %v3387_v14 = vsel %vm818_vm2, %v3336_v49, 0.0 }
 0x141   :  { %v1012_v21 = vsel %vm1011_vm12, %v3247_v7, %v1010_v4  ;;  %v1024_v48 = vmul.f32 %v2554_v41, %v3263_v28  ;;  %v831_v9 = vadd.f32 %v3387_v14, %v829_v53  ;;  %v3393_v12 = vsel %vm1006_vm11, %v1007_v55, %v1005_v0 }
 0x142   :  { %v1041_v31 = vadd.f32 %v3383_v44, %v1039_v29  ;;  %v1014_v6 = vand.u32 2147483648, %v3247_v7  ;;  %v3399_v26 = vsel %vm818_vm2, %v3377_v39, 0.0  ;;  %v1019_v4 = vsel %vm1018_vm13, %v3256_v16, %v1017_v47 }
 0x143   :  { %v1031_v50 = vmul.f32 %v2556_v40, %v3277_v43  ;;  %v833_v41 = vadd.f32 %v3399_v26, %v831_v9  ;;  %v1021_v53 = vand.u32 2147483648, %v3256_v16  ;;  %vm1025_vm15 = vcmp.eq.f32.partialorder %v3263_v28, inf }
 0x144   :  { %v3405_v29 = vsel %vm1013_vm14, %v1014_v6, %v1012_v21  ;;  %vm1020_vm0 = vcmp.eq.f32.partialorder %v3256_v16, 0.0  ;;  %v1026_v0 = vsel %vm1025_vm15, %v3263_v28, %v1024_v48  ;;  %v3413_v55 = vsel %vm818_vm2, %v3393_v12, 0.0 }
 0x145   :  { %4295 = vst [vmem:[#allocation13_spill] sm:$0xff] %v3405_v29  ;;  %v834_v7 = vrot.slane %v833_v41, 4  ;;  %v1028_v47 = vand.u32 2147483648, %v3263_v28  ;;  %vm1032_vm1 = vcmp.eq.f32.partialorder %v3277_v43, inf  ;;  %v3417_v40 = vsel %vm1020_vm0, %v1021_v53, %v1019_v4 }
 0x146   :  { %v1043_v21 = vadd.f32 %v3413_v55, %v1041_v31  ;;  %vm1027_vm3 = vcmp.eq.f32.partialorder %v3263_v28, 0.0  ;;  %v1033_v9 = vsel %vm1032_vm1, %v3277_v43, %v1031_v50  ;;  %v3424_v48 = vsel %vm818_vm2, %v3405_v29, 0.0 }
 0x147   :  { %v835_v16 = vadd.f32 %v834_v7, %v833_v41  ;;  %v1035_v6 = vand.u32 2147483648, %v3277_v43  ;;  %v3427_v37 = vsel %vm1027_vm3, %v1028_v47, %v1026_v0  ;;  %vm1034_vm4 = vcmp.eq.f32.partialorder %v3277_v43, 0.0 }
 0x148   :  { %4296 = vst [vmem:[#allocation14_spill] sm:$0xff] %v3427_v37  ;;  %v1045_v33 = vadd.f32 %v3424_v48, %v1043_v21  ;;  %v3433_v31 = vsel %vm818_vm2, %v3417_v40, 0.0  ;;  %v3440_v53 = vsel %vm818_vm2, %v3427_v37, 0.0  ;;  %vm866_vm5 = vcmask 516096  }
 0x149   :  { %v836_v4 = vrot.slane %v835_v16, 2  ;;  %v3435_v28 = vsel %vm1034_vm4, %v1035_v6, %v1033_v9 }
 0x14a   :  { %4297 = vst [vmem:[#allocation15_spill] sm:$0xff] %v3435_v28  ;;  %v1047_v50 = vadd.f32 %v3433_v31, %v1045_v33  ;;  %v3445_v43 = vsel %vm818_vm2, %v3435_v28, 0.0 }
 0x14b   :  { %v837_v41 = vadd.f32 %v836_v4, %v835_v16 }
 0x14c   :  { %v1049_v0 = vadd.f32 %v3440_v53, %v1047_v50 }
 0x14d   :  { %v838_v7 = vrot.slane %v837_v41, 1 }
 0x14e   :  { %v1051_v47 = vadd.f32 %v3445_v43, %v1049_v0 }
 0x14f   :  { %v839_v21 = vadd.f32 %v838_v7, %v837_v41 }
 0x150   :  { %v1052_v9 = vrot.slane %v1051_v47, 4 }
 0x151   :  { %v3448_v6 = vmul.f32 0.015625, %v839_v21 }
 0x152   :  { %v1053_v33 = vadd.f32 %v1052_v9, %v1051_v47  ;;  %v1341_v47 = vmul.f32 2.0, %v3161_v15  ;;  %v1342_v9 = vmul.f32 2.0, %v3157_v11  ;;  %v1337_v11 = vmul.f32 2.0, %v3128_v42 }
 0x153   :  { %v867_v16 = vsel %vm866_vm5, %v3448_v6, 0.0  ;;  %v1339_v15 = vmul.f32 2.0, %v3151_v45 }
 0x154   :  { %868 = vadd.xlane.f32.xlu0 %v867_v16  ;;  %v1054_v0 = vrot.slane %v1053_v33, 2 }
 0x156   :  { %v1055_v4 = vadd.f32 %v1054_v0, %v1053_v33 }
 0x158   :  { %v1056_v50 = vrot.slane %v1055_v4, 1 }
 0x15a   :  { %v1057_v22 = vadd.f32 %v1056_v50, %v1055_v4  ;;  %v1340_v50 = vmul.f32 2.0, %v3145_v34 }
 0x15c   :  { %v3468_v16 = vmul.f32 0.015625, %v1057_v22  ;;  %v1343_v22 = vmul.f32 2.0, %v3181_v30  ;;  %v1344_v30 = vmul.f32 2.0, %v3174_v27 }
 0x15e   :  { %v1083_v34 = vsel %vm866_vm5, %v3468_v16, 0.0 }
 0x169   :  { %v673_v0 = vpop.xlane.xlu0 %672 }
 0x16a   :  { %v1348_v7 = vsub.f32 %v673_v0, %v1340_v50  ;;  %1356 = vxpose.xlu1.b32.cont [4/8] (short) (narrow) %v673_v0, 8 }
 0x16d   :  { %v676_v21 = vpop.xlane.xlu0 %675 }
 0x16e   :  { %1357 = vxpose.xlu1.b32.cont [5/8] (short) (narrow) %v676_v21, 8  ;;  %v1349_v41 = vsub.f32 %v676_v21, %v1341_v47 }
 0x171   :  { %v679_v29 = vpop.xlane.xlu0 %678 }
 0x172   :  { %1358 = vxpose.xlu1.b32.cont [6/8] (short) (narrow) %v679_v29, 8  ;;  %v1350_v33 = vsub.f32 %v679_v29, %v1342_v9 }
 0x175   :  { %v682_v37 = vpop.xlane.xlu0 %681 }
 0x176   :  { %1359 = vxpose.xlu1.b32.cont [7/8] (short) (narrow) %v682_v37, 8  ;;  %v1351_v4 = vsub.f32 %v682_v37, %v1343_v22  ;;  %v1338_v37 = vmul.f32 2.0, %v3126_v13 }
 0x179   :  { %v685_v28 = vpop.xlane.xlu0 %684 }
 0x17a   :  { %1360 = vxpose.xlu1.b32.end [8/8] (short) (narrow) %v685_v28, 8  ;;  %v1352_v45 = vsub.f32 %v685_v28, %v1344_v30 }
 0x181   :  { %1137 = vxpose.xlu0.b32.start [1/8] (short) (narrow) %v3071_v54, 8 }
 0x185   :  { %1138 = vxpose.xlu0.b32.cont [2/8] (short) (narrow) %v3076_v56, 8 }
 0x189   :  { %1139 = vxpose.xlu0.b32.cont [3/8] (short) (narrow) %v3079_v57, 8 }
 0x18d   :  { %1140 = vxpose.xlu0.b32.cont [4/8] (short) (narrow) %v3082_v58, 8 }
 0x191   :  { %1141 = vxpose.xlu0.b32.cont [5/8] (short) (narrow) %v3084_v59, 8 }
 0x195   :  { %1142 = vxpose.xlu0.b32.cont [6/8] (short) (narrow) %v3086_v60, 8 }
 0x199   :  { %1143 = vxpose.xlu0.b32.cont [7/8] (short) (narrow) %v3088_v61, 8 }
 0x19d   :  { %1144 = vxpose.xlu0.b32.end [8/8] (short) (narrow) %v3090_v62, 8 }
 0x1a1   :  { %842 = vadd.xlane.f32.xlu1 %v3226_v32 }
 0x1a5   :  { %844 = vadd.xlane.f32.xlu1 %v3230_v52  ;;  %v1346_v52 = vsub.f32 %v3097_v3, %v1338_v37 }
 0x1a9   :  { %846 = vadd.xlane.f32.xlu1 %v3275_v19  ;;  %v1345_v19 = vsub.f32 %v3094_v2, %v1337_v11 }
 0x1ad   :  { %848 = vadd.xlane.f32.xlu1 %v3305_v5  ;;  %v1347_v5 = vsub.f32 %v3106_v63, %v1339_v15 }
 0x1b1   :  { %850 = vadd.xlane.f32.xlu1 %v3320_v25 }
 0x1b5   :  { %854 = vadd.xlane.f32.xlu1 %v3387_v14 }
 0x1ca   :  { %852 = vadd.xlane.f32.xlu0 %v3340_v1 }
 0x1ce   :  { %1084 = vadd.xlane.f32.xlu0 %v1083_v34 }
 0x1d2   :  { %856 = vadd.xlane.f32.xlu0 %v3399_v26 }
 0x1d6   :  { %1059 = vadd.xlane.f32.xlu0 %v3359_v46 }
 0x1da   :  { %1061 = vadd.xlane.f32.xlu0 %v3369_v18 }
 0x1de   :  { %v1369_v32 = vpop.trf.xlu1  ;;  %1063 = vadd.xlane.f32.xlu0 %v3383_v44 }
 0x1df   :  { %v1388_v25 = vrot.slane %v1369_v32, %v3118_v35 }
 0x1e1   :  { %v1389_v13 = vadd.f32 %v1388_v25, %v1345_v19  ;;  %v1390_v1 = vadd.f32 %v1388_v25, %v1346_v52  ;;  %v1391_v42 = vadd.f32 %v1388_v25, %v1347_v5  ;;  %v1392_v14 = vadd.f32 %v1388_v25, %v1348_v7  ;;  %v869_v50 = vpop.xlane.xlu0 %868 }
 0x1e2   :  { %v1393_v26 = vadd.f32 %v1388_v25, %v1349_v41  ;;  %v1394_v46 = vadd.f32 %v1388_v25, %v1350_v33  ;;  %v1395_v29 = vadd.f32 %v1388_v25, %v1351_v4  ;;  %v1396_v21 = vadd.f32 %v1388_v25, %v1352_v45  ;;  %1065 = vadd.xlane.f32.xlu0 %v3413_v55 }
 0x1e3   :  { %v1397_v27 = vmax.f32 %v1389_v13, 0.0  ;;  %v1398_v3 = vmax.f32 %v1390_v1, 0.0  ;;  %v1399_v47 = vmax.f32 %v1391_v42, 0.0  ;;  %v1400_v2 = vmax.f32 %v1392_v14, 0.0 }
 0x1e4   :  { %v1401_v63 = vmax.f32 %v1393_v26, 0.0  ;;  %v1402_v9 = vmax.f32 %v1394_v46, 0.0  ;;  %v1403_v0 = vmax.f32 %v1395_v29, 0.0  ;;  %v870_v7 = vrot.slane %v869_v50, 4 }
 0x1e5   :  { %v1405_v18 = vadd.f32 1e-08, %v1397_v27  ;;  %v1406_v22 = vadd.f32 1e-08, %v1398_v3  ;;  %v3519_v34 = vadd.f32 1e-08, %v1399_v47 }
 0x1e6   :  { %v3522_v28 = vadd.f32 1e-08, %v1400_v2  ;;  %v1404_v44 = vmax.f32 %v1396_v21, 0.0  ;;  %v3524_v41 = vadd.f32 1e-08, %v1401_v63  ;;  %v871_v33 = vadd.f32 %v870_v7, %v869_v50  ;;  %1067 = vadd.xlane.f32.xlu0 %v3424_v48 }
 0x1e7   :  { %2557 = vrsqrt.f32 %v1405_v18  ;;  %v3526_v4 = vadd.f32 1e-08, %v1402_v9  ;;  %v3528_v37 = vadd.f32 1e-08, %v1403_v0  ;;  %vm1415_vm6 = vcmp.eq.f32.partialorder %v1405_v18, inf }
 0x1e8   :  { %2559 = vrsqrt.f32 %v1406_v22  ;;  %v872_v11 = vrot.slane %v871_v33, 2  ;;  %v3533_v55 = vadd.f32 1e-08, %v1404_v44  ;;  %vm1417_vm7 = vcmp.eq.f32.partialorder %v1405_v18, 0.0 }
 0x1e9   :  { %2561 = vrsqrt.f32 %v3519_v34  ;;  %v1418_v48 = vand.u32 2147483648, %v1405_v18  ;;  %vm1422_vm8 = vcmp.eq.f32.partialorder %v1406_v22, inf  ;;  %vm1424_vm9 = vcmp.eq.f32.partialorder %v1406_v22, 0.0 }
 0x1ea   :  { %2563 = vrsqrt.f32 %v3522_v28  ;;  %1069 = vadd.xlane.f32.xlu0 %v3433_v31  ;;  %v873_v15 = vadd.f32 %v872_v11, %v871_v33  ;;  %v1425_v32 = vand.u32 2147483648, %v1406_v22  ;;  %vm1429_vm10 = vcmp.eq.f32.partialorder %v3519_v34, inf }
 0x1eb   :  { %2565 = vrsqrt.f32 %v3524_v41  ;;  %vm1431_vm11 = vcmp.eq.f32.partialorder %v3519_v34, 0.0  ;;  %v1432_v31 = vand.u32 2147483648, %v3519_v34  ;;  %vm1436_vm12 = vcmp.eq.f32.partialorder %v3522_v28, inf }
 0x1ec   :  { %2567 = vrsqrt.f32 %v3526_v4  ;;  %v874_v5 = vrot.slane %v873_v15, 1  ;;  %vm1438_vm13 = vcmp.eq.f32.partialorder %v3522_v28, 0.0  ;;  %v1439_v42 = vand.u32 2147483648, %v3522_v28 }
 0x1ed   :  { %2569 = vrsqrt.f32 %v3528_v37  ;;  %vm1443_vm14 = vcmp.eq.f32.partialorder %v3524_v41, inf  ;;  %vm1445_vm15 = vcmp.eq.f32.partialorder %v3524_v41, 0.0  ;;  %v1446_v47 = vand.u32 2147483648, %v3524_v41 }
 0x1ee   :  { %2571 = vrsqrt.f32 %v3533_v55  ;;  %1071 = vadd.xlane.f32.xlu0 %v3440_v53  ;;  %v875_v14 = vadd.f32 %v874_v5, %v873_v15  ;;  %vm1450_vm0 = vcmp.eq.f32.partialorder %v3526_v4, inf  ;;  %vm1452_vm1 = vcmp.eq.f32.partialorder %v3526_v4, 0.0 }
 0x1ef   :  { %vm1457_vm3 = vcmp.eq.f32.partialorder %v3528_v37, inf  ;;  %vm1459_vm4 = vcmp.eq.f32.partialorder %v3528_v37, 0.0 }
 0x1f0   :  { %2450 = vpush %v875_v14 }
 0x1f1   :  { %v2558_v30 = vpop.eup %2557 }
 0x1f2   :  { %v2560_v52 = vpop.eup %2559  ;;  %v1414_v19 = vmul.f32 %v2558_v30, %v1405_v18  ;;  %1073 = vadd.xlane.f32.xlu0 %v3445_v43 }
 0x1f3   :  { %v1421_v25 = vmul.f32 %v2560_v52, %v1406_v22  ;;  %v2562_v13 = vpop.eup %2561 }
 0x1f4   :  { %v1416_v1 = vsel %vm1415_vm6, %v1405_v18, %v1414_v19  ;;  %v2564_v45 = vpop.eup %2563  ;;  %v1428_v29 = vmul.f32 %v2562_v13, %v3519_v34  ;;  %vm1464_vm6 = vcmp.eq.f32.partialorder %v3533_v55, inf }
 0x1f5   :  { %v3550_v26 = vsel %vm1417_vm7, %v1418_v48, %v1416_v1  ;;  %v1423_v46 = vsel %vm1422_vm8, %v1406_v22, %v1421_v25  ;;  %v2566_v27 = vpop.eup %2565  ;;  %v1435_v3 = vmul.f32 %v2564_v45, %v3522_v28  ;;  %v4298_v45 = vld [vmem:[#allocation5_spill] sm:$0xff]  ;;  %vm1466_vm7 = vcmp.eq.f32.partialorder %v3533_v55, 0.0 }
 0x1f6   :  { %v3556_v53 = vsel %vm1424_vm9, %v1425_v32, %v1423_v46  ;;  %v3562_v2 = vsel %vm818_vm2, %v3550_v26, 0.0  ;;  %v2568_v21 = vpop.eup %2567  ;;  %v1430_v63 = vsel %vm1429_vm10, %v3519_v34, %v1428_v29  ;;  %v1442_v9 = vmul.f32 %v2566_v27, %v3524_v41  ;;  %v4299_v27 = vld [vmem:[#allocation6_spill] sm:$0xff] }
 0x1f7   :  { %v3571_v18 = vsel %vm818_vm2, %v3556_v53, 0.0  ;;  %v2570_v22 = vpop.eup %2569  ;;  %v3576_v50 = vsel %vm1431_vm11, %v1432_v31, %v1430_v63  ;;  %v1437_v0 = vsel %vm1436_vm12, %v3522_v28, %v1435_v3  ;;  %v1449_v7 = vmul.f32 %v2568_v21, %v3526_v4  ;;  %v4301_v63 = vld [vmem:[#allocation8_spill] sm:$0xff] }
 0x1f8   :  { %v1471_v44 = vadd.f32 %v3571_v18, %v3562_v2  ;;  %v3586_v33 = vsel %vm1438_vm13, %v1439_v42, %v1437_v0  ;;  %v1444_v43 = vsel %vm1443_vm14, %v3524_v41, %v1442_v9  ;;  %v1456_v34 = vmul.f32 %v2570_v22, %v3528_v37  ;;  %v2572_v15 = vpop.eup %2571  ;;  %v4302_v22 = vld [vmem:[#allocation9_spill] sm:$0xff] }
 0x1f9   :  { %v3594_v11 = vsel %vm818_vm2, %v3576_v50, 0.0  ;;  %v3598_v30 = vsel %vm1445_vm15, %v1446_v47, %v1444_v43  ;;  %v1451_v48 = vsel %vm1450_vm0, %v3526_v4, %v1449_v7  ;;  %v1453_v28 = vand.u32 2147483648, %v3526_v4  ;;  %v4300_v47 = vld [vmem:[#allocation7_spill] sm:$0xff]  ;;  %v4303_v7 = vld [vmem:[#allocation10_spill] sm:$0xff] }
 0x1fa   :  { %v1473_v32 = vadd.f32 %v3594_v11, %v1471_v44  ;;  %v3606_v52 = vsel %vm818_vm2, %v3586_v33, 0.0  ;;  %v1458_v5 = vsel %vm1457_vm3, %v3528_v37, %v1456_v34  ;;  %v1463_v25 = vmul.f32 %v2572_v15, %v3533_v55  ;;  %v4304_v34 = vld [vmem:[#allocation11_spill] sm:$0xff] }
 0x1fb   :  { %v3609_v19 = vsel %vm1452_vm1, %v1453_v28, %v1451_v48  ;;  %v3616_v31 = vsel %vm818_vm2, %v3598_v30, 0.0  ;;  %v1460_v4 = vand.u32 2147483648, %v3528_v37  ;;  %v1122_v46 = vmul.f32 2.0, %v4298_v45  ;;  %v4305_v48 = vld [vmem:[#allocation12_spill] sm:$0xff] }
 0x1fc   :  { %v1475_v41 = vadd.f32 %v3606_v52, %v1473_v32  ;;  %v3623_v1 = vsel %vm818_vm2, %v3609_v19, 0.0  ;;  %v1465_v29 = vsel %vm1464_vm6, %v3533_v55, %v1463_v25  ;;  %v1121_v3 = vmul.f32 2.0, %v4299_v27 }
 0x1fd   :  { %v3626_v42 = vsel %vm1459_vm4, %v1460_v4, %v1458_v5  ;;  %v1124_v21 = vmul.f32 2.0, %v4300_v47  ;;  %v1123_v37 = vmul.f32 2.0, %v4301_v63  ;;  %v1467_v9 = vand.u32 2147483648, %v3533_v55 }
 0x1fe   :  { %v1477_v13 = vadd.f32 %v3616_v31, %v1475_v41  ;;  %v1126_v0 = vmul.f32 2.0, %v4302_v22  ;;  %v1125_v44 = vmul.f32 2.0, %v4303_v7  ;;  %v3640_v43 = vsel %vm818_vm2, %v3626_v42, 0.0 }
 0x1ff   :  { %v1128_v15 = vmul.f32 2.0, %v4304_v34  ;;  %v1127_v28 = vmul.f32 2.0, %v4305_v48  ;;  %v3644_v32 = vsel %vm1466_vm7, %v1467_v9, %v1465_v29  ;;  %v1130_v5 = vsub.f32 %v3076_v56, %v1122_v46 }
 0x200   :  { %v1479_v14 = vadd.f32 %v3623_v1, %v1477_v13  ;;  %4306 = vst [vmem:[#allocation5_spill] sm:$0xff] %v3644_v32  ;;  %v1129_v25 = vsub.f32 %v3071_v54, %v1121_v3  ;;  %v1132_v4 = vsub.f32 %v3082_v58, %v1124_v21  ;;  %v1131_v55 = vsub.f32 %v3079_v57, %v1123_v37 }
 0x201   :  { %v1153_v13 = vpop.trf.xlu0  ;;  %v1134_v45 = vsub.f32 %v3086_v60, %v1126_v0  ;;  %v3655_v47 = vsel %vm818_vm2, %v3644_v32, 0.0  ;;  %v1133_v29 = vsub.f32 %v3084_v59, %v1125_v44  ;;  %v1135_v56 = vsub.f32 %v3088_v61, %v1127_v28 }
 0x202   :  { %v1481_v41 = vadd.f32 %v3640_v43, %v1479_v14  ;;  %v1172_v27 = vrot.slane %v1153_v13, %v3118_v35  ;;  %v1136_v14 = vsub.f32 %v3090_v62, %v1128_v15 }
 0x204   :  { %v1483_v54 = vadd.f32 %v3655_v47, %v1481_v41  ;;  %v1173_v58 = vadd.f32 %v1172_v27, %v1129_v25  ;;  %v1174_v46 = vadd.f32 %v1172_v27, %v1130_v5  ;;  %v1175_v3 = vadd.f32 %v1172_v27, %v1131_v55 }
 0x205   :  { %v1176_v57 = vadd.f32 %v1172_v27, %v1132_v4  ;;  %v1177_v21 = vadd.f32 %v1172_v27, %v1133_v29  ;;  %v1178_v60 = vadd.f32 %v1172_v27, %v1134_v45  ;;  %v1179_v63 = vadd.f32 %v1172_v27, %v1135_v56 }
 0x206   :  { %v1180_v35 = vadd.f32 %v1172_v27, %v1136_v14  ;;  %v1181_v37 = vmax.f32 %v1173_v58, 0.0  ;;  %v1182_v9 = vmax.f32 %v1174_v46, 0.0  ;;  %v1183_v22 = vmax.f32 %v1175_v3, 0.0 }
 0x207   :  { %v1184_v0 = vmax.f32 %v1176_v57, 0.0  ;;  %v1185_v7 = vmax.f32 %v1177_v21, 0.0  ;;  %v1186_v59 = vmax.f32 %v1178_v60, 0.0  ;;  %v1187_v44 = vmax.f32 %v1179_v63, 0.0 }
 0x208   :  { %v1189_v62 = vadd.f32 1e-08, %v1181_v37  ;;  %v1190_v34 = vadd.f32 1e-08, %v1182_v9  ;;  %v1191_v61 = vadd.f32 1e-08, %v1183_v22 }
 0x209   :  { %v1188_v15 = vmax.f32 %v1180_v35, 0.0  ;;  %v1192_v48 = vadd.f32 1e-08, %v1184_v0  ;;  %v3661_v28 = vadd.f32 1e-08, %v1185_v7  ;;  %v1484_v41 = vrot.slane %v1483_v54, 4 }
 0x20a   :  { %2573 = vrsqrt.f32 %v1189_v62  ;;  %v3663_v5 = vadd.f32 1e-08, %v1186_v59  ;;  %v3665_v25 = vadd.f32 1e-08, %v1187_v44  ;;  %vm1199_vm8 = vcmp.eq.f32.partialorder %v1189_v62, inf }
 0x20b   :  { %2575 = vrsqrt.f32 %v1190_v34  ;;  %v3667_v4 = vadd.f32 1e-08, %v1188_v15  ;;  %v1485_v13 = vadd.f32 %v1484_v41, %v1483_v54  ;;  %vm1201_vm9 = vcmp.eq.f32.partialorder %v1189_v62, 0.0 }
 0x20c   :  { %2577 = vrsqrt.f32 %v1191_v61  ;;  %v1202_v55 = vand.u32 2147483648, %v1189_v62  ;;  %vm1206_vm10 = vcmp.eq.f32.partialorder %v1190_v34, inf  ;;  %vm1208_vm11 = vcmp.eq.f32.partialorder %v1190_v34, 0.0 }
 0x20d   :  { %2579 = vrsqrt.f32 %v1192_v48  ;;  %v1486_v45 = vrot.slane %v1485_v13, 2  ;;  %v1209_v27 = vand.u32 2147483648, %v1190_v34  ;;  %vm1213_vm12 = vcmp.eq.f32.partialorder %v1191_v61, inf }
 0x20e   :  { %2581 = vrsqrt.f32 %v3661_v28  ;;  %vm1215_vm13 = vcmp.eq.f32.partialorder %v1191_v61, 0.0  ;;  %v1216_v14 = vand.u32 2147483648, %v1191_v61  ;;  %vm1220_vm14 = vcmp.eq.f32.partialorder %v1192_v48, inf }
 0x20f   :  { %2583 = vrsqrt.f32 %v3663_v5  ;;  %v1487_v56 = vadd.f32 %v1486_v45, %v1485_v13  ;;  %vm1222_vm15 = vcmp.eq.f32.partialorder %v1192_v48, 0.0  ;;  %v1223_v46 = vand.u32 2147483648, %v1192_v48 }
 0x210   :  { %2585 = vrsqrt.f32 %v3665_v25  ;;  %vm1227_vm0 = vcmp.eq.f32.partialorder %v3661_v28, inf  ;;  %vm1229_vm1 = vcmp.eq.f32.partialorder %v3661_v28, 0.0  ;;  %v1230_v21 = vand.u32 2147483648, %v3661_v28 }
 0x211   :  { %2587 = vrsqrt.f32 %v3667_v4  ;;  %v1488_v60 = vrot.slane %v1487_v56, 1  ;;  %vm1234_vm3 = vcmp.eq.f32.partialorder %v3663_v5, inf  ;;  %v1237_v9 = vand.u32 2147483648, %v3663_v5 }
 0x212   :  { %vm1241_vm4 = vcmp.eq.f32.partialorder %v3665_v25, inf  ;;  %vm1236_vm6 = vcmp.eq.f32.partialorder %v3663_v5, 0.0  ;;  %vm1243_vm7 = vcmp.eq.f32.partialorder %v3665_v25, 0.0 }
 0x213   :  { %v1489_v44 = vadd.f32 %v1488_v60, %v1487_v56 }
 0x214   :  { %v2574_v29 = vpop.eup %2573 }
 0x215   :  { %v2576_v54 = vpop.eup %2575  ;;  %v1198_v58 = vmul.f32 %v2574_v29, %v1189_v62 }
 0x216   :  { %v2578_v3 = vpop.eup %2577  ;;  %v1205_v57 = vmul.f32 %v2576_v54, %v1190_v34 }
 0x217   :  { %v2580_v63 = vpop.eup %2579  ;;  %v1200_v35 = vsel %vm1199_vm8, %v1189_v62, %v1198_v58  ;;  %v1212_v37 = vmul.f32 %v2578_v3, %v1191_v61  ;;  %vm1248_vm8 = vcmp.eq.f32.partialorder %v3667_v4, inf }
 0x218   :  { %v2582_v22 = vpop.eup %2581  ;;  %v3680_v0 = vsel %vm1201_vm9, %v1202_v55, %v1200_v35  ;;  %v1207_v7 = vsel %vm1206_vm10, %v1190_v34, %v1205_v57  ;;  %v1219_v59 = vmul.f32 %v2580_v63, %v1192_v48  ;;  %vm1250_vm9 = vcmp.eq.f32.partialorder %v3667_v4, 0.0 }
 0x219   :  { %v2584_v15 = vpop.eup %2583  ;;  %v3684_v41 = vsel %vm1208_vm11, %v1209_v27, %v1207_v7  ;;  %v1214_v13 = vsel %vm1213_vm12, %v1191_v61, %v1212_v37  ;;  %v1226_v45 = vmul.f32 %v2582_v22, %v3661_v28  ;;  %v3690_v29 = vsel %vm818_vm2, %v3680_v0, 0.0 }
 0x21a   :  { %v2586_v54 = vpop.eup %2585  ;;  %v3693_v62 = vsel %vm1215_vm13, %v1216_v14, %v1214_v13  ;;  %v1221_v55 = vsel %vm1220_vm14, %v1192_v48, %v1219_v59  ;;  %v1233_v56 = vmul.f32 %v2584_v15, %v3663_v5  ;;  %v3699_v34 = vsel %vm818_vm2, %v3684_v41, 0.0 }
 0x21b   :  { %v2588_v27 = vpop.eup %2587  ;;  %v3702_v58 = vsel %vm1222_vm15, %v1223_v46, %v1221_v55  ;;  %v1228_v3 = vsel %vm1227_vm0, %v3661_v28, %v1226_v45  ;;  %v1240_v61 = vmul.f32 %v2586_v54, %v3665_v25  ;;  %v1255_v14 = vadd.f32 %v3699_v34, %v3690_v29 }
 0x21c   :  { %v1235_v57 = vsel %vm1234_vm3, %v3663_v5, %v1233_v56  ;;  %v1247_v60 = vmul.f32 %v2588_v27, %v3667_v4  ;;  %v1256_v48 = vsel %vm818_vm2, %v3693_v62, 0.0  ;;  %v3719_v46 = vsel %vm1229_vm1, %v1230_v21, %v1228_v3 }
 0x21d   :  { %v1242_v63 = vsel %vm1241_vm4, %v3665_v25, %v1240_v61  ;;  %v1257_v35 = vadd.f32 %v1256_v48, %v1255_v14  ;;  %v1244_v37 = vand.u32 2147483648, %v3665_v25  ;;  %v3727_v22 = vsel %vm818_vm2, %v3702_v58, 0.0 }
 0x21e   :  { %v3729_v7 = vsel %vm1236_vm6, %v1237_v9, %v1235_v57  ;;  %v3734_v5 = vmul.f32 0.015625, %v1489_v44  ;;  %v1249_v21 = vsel %vm1248_vm8, %v3667_v4, %v1247_v60  ;;  %v1251_v59 = vand.u32 2147483648, %v3667_v4 }
 0x21f   :  { %v1259_v28 = vadd.f32 %v3727_v22, %v1257_v35  ;;  %v3738_v15 = vsel %vm1243_vm7, %v1244_v37, %v1242_v63  ;;  %v1260_v25 = vsel %vm818_vm2, %v3719_v46, 0.0  ;;  %v3744_v9 = vsel %vm818_vm2, %v3729_v7, 0.0 }
 0x220   :  { %v3758_v27 = vsel %vm1250_vm9, %v1251_v59, %v1249_v21  ;;  %v1264_v57 = vsel %vm818_vm2, %v3738_v15, 0.0 }
 0x221   :  { %v1261_v13 = vadd.f32 %v1260_v25, %v1259_v28  ;;  %v3769_v63 = vsel %vm818_vm2, %v3758_v27, 0.0  ;;  %s2451_s0 = spop %2450 }
 0x222   :  { %s879_s12 = smul.f32 0.015625, %s2451_s0 }
 0x223   :  { %v1263_v3 = vadd.f32 %v3744_v9, %v1261_v13 }
 0x225   :  { %v1265_v60 = vadd.f32 %v1264_v57, %v1263_v3 }
 0x227   :  { %v1267_v35 = vadd.f32 %v3769_v63, %v1265_v60 }
 0x229   :  { %v1268_v37 = vrot.slane %v1267_v35, 4 }
 0x22b   :  { %v1269_v28 = vadd.f32 %v1268_v37, %v1267_v35 }
 0x22d   :  { %v1270_v21 = vrot.slane %v1269_v28, 2 }
 0x22e   :  { %v843_v61 = vpop.xlane.xlu1 %842 }
 0x22f   :  { %v1271_v59 = vadd.f32 %v1270_v21, %v1269_v28  ;;  %v858_v45 = vmul.f32 0.015625, %v843_v61  ;;  %v4307_v21 = vsub.f32 %v3216_v23, %v3448_v6 }
 0x231   :  { %v1272_v13 = vrot.slane %v1271_v59, 1 }
 0x232   :  { %v845_v37 = vpop.xlane.xlu1 %844 }
 0x233   :  { %v1273_v56 = vadd.f32 %v1272_v13, %v1271_v59  ;;  %v859_v44 = vmul.f32 0.015625, %v845_v37 }
 0x235   :  { %v3772_v55 = vmul.f32 0.015625, %v1273_v56  ;;  %v889_v59 = vsub.f32 %v4307_v21, %v859_v44 }
 0x236   :  { %v847_v13 = vpop.xlane.xlu1 %846 }
 0x237   :  { %v1299_v14 = vsel %vm866_vm5, %v3772_v55, 0.0  ;;  %v860_v35 = vmul.f32 0.015625, %v847_v13  ;;  %v4310_v13 = vsub.f32 %v3282_v51, %v3448_v6 }
 0x238   :  { %1300 = vadd.xlane.f32.xlu1 %v1299_v14  ;;  %v1515_v14 = vsel %vm866_vm5, %v3734_v5, 0.0 }
 0x23a   :  { %v849_v54 = vpop.xlane.xlu1 %848 }
 0x23b   :  { %v861_v56 = vmul.f32 0.015625, %v849_v54 }
 0x23c   :  { %1516 = vadd.xlane.f32.xlu1 %v1515_v14  ;;  %v4308_v14 = vsub.f32 %v3212_v20, %v3448_v6  ;;  %v4311_v20 = vsub.f32 %v3293_v38, %v3448_v6 }
 0x23d   :  { %v891_v3 = vsub.f32 %v4310_v13, %v861_v56 }
 0x23e   :  { %v851_v60 = vpop.xlane.xlu1 %850  ;;  %v888_v4 = vsub.f32 %v4308_v14, %v858_v45 }
 0x23f   :  { %v862_v37 = vmul.f32 0.015625, %v851_v60 }
 0x240   :  { %1275 = vadd.xlane.f32.xlu1 %v3690_v29  ;;  %v4309_v29 = vsub.f32 %v3252_v8, %v3448_v6 }
 0x241   :  { %v892_v45 = vsub.f32 %v4311_v20, %v862_v37 }
 0x242   :  { %v855_v54 = vpop.xlane.xlu1 %854 }
 0x244   :  { %1279 = vadd.xlane.f32.xlu1 %v1256_v48  ;;  %v890_v48 = vsub.f32 %v4309_v29, %v860_v35  ;;  %v864_v35 = vmul.f32 0.015625, %v855_v54 }
 0x248   :  { %1283 = vadd.xlane.f32.xlu1 %v1260_v25  ;;  %v896_v25 = vstv %s879_s12 }
 0x249   :  { %v3804_v61 = vadd.f32 %v896_v25, %v889_v59  ;;  %v3809_v23 = vadd.f32 %v896_v25, %v888_v4  ;;  %v3811_v44 = vadd.f32 %v896_v25, %v890_v48  ;;  %v3824_v4 = vadd.f32 %v896_v25, %v892_v45 }
 0x24a   :  { %v4313_v48 = vsub.f32 %v3316_v10, %v3448_v6 }
 0x24b   :  { %v1554_v8 = vmul.f32 %v3804_v61, %v3804_v61  ;;  %v1553_v60 = vmul.f32 %v3809_v23, %v3809_v23  ;;  %v1555_v51 = vmul.f32 %v3811_v44, %v3811_v44  ;;  %v1557_v13 = vmul.f32 %v3824_v4, %v3824_v4 }
 0x24c   :  { %1287 = vadd.xlane.f32.xlu1 %v1264_v57  ;;  %v3818_v57 = vadd.f32 %v896_v25, %v891_v3  ;;  %v4312_v3 = vsub.f32 %v3336_v49, %v3448_v6 }
 0x24d   :  { %v1562_v59 = vsel %vm818_vm2, %v1554_v8, 0.0  ;;  %v1561_v14 = vsel %vm818_vm2, %v1553_v60, 0.0  ;;  %v1564_v20 = vsel %vm818_vm2, %v1555_v51, 0.0 }
 0x24e   :  { %v1556_v38 = vmul.f32 %v3818_v57, %v3818_v57  ;;  %v894_v29 = vsub.f32 %v4312_v3, %v864_v35  ;;  %v1563_v54 = vadd.f32 %v1562_v59, %v1561_v14  ;;  %v1568_v35 = vsel %vm818_vm2, %v1557_v13, 0.0 }
 0x250   :  { %v1566_v60 = vsel %vm818_vm2, %v1556_v38, 0.0  ;;  %v1565_v28 = vadd.f32 %v1564_v20, %v1563_v54  ;;  %v3842_v32 = vadd.f32 %v896_v25, %v894_v29 }
 0x252   :  { %v1567_v3 = vadd.f32 %v1566_v60, %v1565_v28  ;;  %v1559_v29 = vmul.f32 %v3842_v32, %v3842_v32 }
 0x254   :  { %v1569_v14 = vadd.f32 %v1568_v35, %v1567_v3  ;;  %v1572_v60 = vsel %vm818_vm2, %v1559_v29, 0.0 }
 0x257   :  { %v853_v56 = vpop.xlane.xlu0 %852 }
 0x258   :  { %v863_v21 = vmul.f32 0.015625, %v853_v56 }
 0x25a   :  { %v893_v37 = vsub.f32 %v4313_v48, %v863_v21 }
 0x25b   :  { %v1085_v45 = vpop.xlane.xlu0 %1084 }
 0x25c   :  { %v3839_v56 = vadd.f32 %v896_v25, %v893_v37  ;;  %v1086_v8 = vrot.slane %v1085_v45, 4  ;;  %v4314_v37 = vsub.f32 %v3377_v39, %v3448_v6 }
 0x25e   :  { %v1087_v49 = vadd.f32 %v1086_v8, %v1085_v45  ;;  %v1558_v10 = vmul.f32 %v3839_v56, %v3839_v56 }
 0x25f   :  { %v857_v21 = vpop.xlane.xlu0 %856 }
 0x260   :  { %v1088_v48 = vrot.slane %v1087_v49, 2  ;;  %v865_v51 = vmul.f32 0.015625, %v857_v21  ;;  %v1570_v59 = vsel %vm818_vm2, %v1558_v10, 0.0 }
 0x261   :  { %v1571_v45 = vadd.f32 %v1570_v59, %v1569_v14 }
 0x262   :  { %v895_v38 = vsub.f32 %v4314_v37, %v865_v51  ;;  %v1089_v20 = vadd.f32 %v1088_v48, %v1087_v49 }
 0x263   :  { %v1573_v10 = vadd.f32 %v1572_v60, %v1571_v45  ;;  %v1060_v6 = vpop.xlane.xlu0 %1059 }
 0x264   :  { %v3853_v54 = vadd.f32 %v896_v25, %v895_v38  ;;  %v1090_v8 = vrot.slane %v1089_v20, 1  ;;  %v1075_v51 = vmul.f32 0.015625, %v1060_v6 }
 0x266   :  { %v1091_v13 = vadd.f32 %v1090_v8, %v1089_v20  ;;  %v1560_v28 = vmul.f32 %v3853_v54, %v3853_v54  ;;  %v4318_v20 = vsub.f32 %v3393_v12, %v3468_v16  ;;  %v4319_v8 = vld [vmem:[#allocation13_spill] sm:$0xff] }
 0x267   :  { %v1062_v25 = vpop.xlane.xlu0 %1061 }
 0x268   :  { %2452 = vpush %v1091_v13  ;;  %v1574_v35 = vsel %vm818_vm2, %v1560_v28, 0.0  ;;  %v4320_v13 = vsub.f32 %v4319_v8, %v3468_v16 }
 0x269   :  { %v1575_v39 = vadd.f32 %v1574_v35, %v1573_v10 }
 0x26b   :  { %1576 = vadd.xlane.f32.xlu0 %v1575_v39  ;;  %v1064_v49 = vpop.xlane.xlu0 %1063 }
 0x26c   :  { %v1077_v59 = vmul.f32 0.015625, %v1064_v49 }
 0x26f   :  { %1277 = vadd.xlane.f32.xlu0 %v3699_v34  ;;  %v1066_v21 = vpop.xlane.xlu0 %1065 }
 0x270   :  { %v1078_v14 = vmul.f32 0.015625, %v1066_v21 }
 0x272   :  { %v1107_v29 = vsub.f32 %v4318_v20, %v1078_v14 }
 0x273   :  { %1281 = vadd.xlane.f32.xlu0 %v3727_v22  ;;  %v1068_v3 = vpop.xlane.xlu0 %1067  ;;  %v1076_v22 = vmul.f32 0.015625, %v1062_v25 }
 0x277   :  { %1285 = vadd.xlane.f32.xlu0 %v3744_v9  ;;  %v1070_v34 = vpop.xlane.xlu0 %1069  ;;  %v1079_v9 = vmul.f32 0.015625, %v1068_v3 }
 0x279   :  { %v1108_v28 = vsub.f32 %v4320_v13, %v1079_v9 }
 0x27b   :  { %1289 = vadd.xlane.f32.xlu0 %v3769_v63  ;;  %v1072_v48 = vpop.xlane.xlu0 %1071  ;;  %v1080_v63 = vmul.f32 0.015625, %v1070_v34  ;;  %v4322_v34 = vld [vmem:[#allocation14_spill] sm:$0xff] }
 0x27c   :  { %v1081_v60 = vmul.f32 0.015625, %v1072_v48  ;;  %v4323_v48 = vsub.f32 %v4322_v34, %v3468_v16 }
 0x27f   :  { %1491 = vadd.xlane.f32.xlu0 %v3562_v2  ;;  %v4315_v2 = vsub.f32 %v3344_v17, %v3468_v16  ;;  %v1074_v45 = vpop.xlane.xlu0 %1073 }
 0x280   :  { %v1082_v6 = vmul.f32 0.015625, %v1074_v45 }
 0x281   :  { %v1104_v37 = vsub.f32 %v4315_v2, %v1075_v51  ;;  %v1110_v51 = vsub.f32 %v4323_v48, %v1081_v60 }
 0x283   :  { %1495 = vadd.xlane.f32.xlu0 %v3594_v11  ;;  %v4316_v11 = vsub.f32 %v3353_v24, %v3468_v16 }
 0x287   :  { %1499 = vadd.xlane.f32.xlu0 %v3616_v31  ;;  %v1105_v31 = vsub.f32 %v4316_v11, %v1076_v22 }
 0x28b   :  { %1503 = vadd.xlane.f32.xlu0 %v3640_v43  ;;  %v4317_v43 = vsub.f32 %v3363_v36, %v3468_v16  ;;  %v4321_v36 = vsub.f32 %v3417_v40, %v3468_v16 }
 0x28d   :  { %v1106_v38 = vsub.f32 %v4317_v43, %v1077_v59  ;;  %v1109_v12 = vsub.f32 %v4321_v36, %v1080_v63  ;;  %v4324_v63 = vld [vmem:[#allocation15_spill] sm:$0xff] }
 0x28e   :  { %v4325_v2 = vsub.f32 %v4324_v63, %v3468_v16 }
 0x299   :  { %s2453_s13 = spop %2452 }
 0x29a   :  { %s1095_s14 = smul.f32 0.015625, %s2453_s13 }
 0x29c   :  { %v1112_v17 = vstv %s1095_s14 }
 0x29d   :  { %v3882_v10 = vadd.f32 %v1112_v17, %v1104_v37  ;;  %v3884_v35 = vadd.f32 %v1112_v17, %v1105_v31  ;;  %v3886_v24 = vadd.f32 %v1112_v17, %v1106_v38  ;;  %v3888_v39 = vadd.f32 %v1112_v17, %v1107_v29 }
 0x29e   :  { %v3893_v25 = vadd.f32 %v1112_v17, %v1108_v28  ;;  %v3904_v22 = vadd.f32 %v1112_v17, %v1109_v12  ;;  %v1111_v37 = vsub.f32 %v4325_v2, %v1082_v6  ;;  %v3913_v11 = vadd.f32 %v1112_v17, %v1110_v51 }
 0x29f   :  { %v1597_v49 = vmul.f32 %v3882_v10, %v3882_v10  ;;  %v1598_v21 = vmul.f32 %v3884_v35, %v3884_v35  ;;  %v1599_v3 = vmul.f32 %v3886_v24, %v3886_v24  ;;  %v1600_v40 = vmul.f32 %v3888_v39, %v3888_v39 }
 0x2a0   :  { %v1601_v31 = vmul.f32 %v3893_v25, %v3893_v25  ;;  %v3918_v20 = vadd.f32 %v1112_v17, %v1111_v37  ;;  %v1602_v29 = vmul.f32 %v3904_v22, %v3904_v22  ;;  %v1603_v16 = vmul.f32 %v3913_v11, %v3913_v11 }
 0x2a1   :  { %v1605_v59 = vsel %vm818_vm2, %v1597_v49, 0.0  ;;  %v1606_v14 = vsel %vm818_vm2, %v1598_v21, 0.0  ;;  %v1608_v43 = vsel %vm818_vm2, %v1599_v3, 0.0  ;;  %v1610_v45 = vsel %vm818_vm2, %v1600_v40, 0.0 }
 0x2a2   :  { %v1607_v9 = vadd.f32 %v1606_v14, %v1605_v59  ;;  %v1612_v13 = vsel %vm818_vm2, %v1601_v31, 0.0  ;;  %v1604_v60 = vmul.f32 %v3918_v20, %v3918_v20  ;;  %v1614_v36 = vsel %vm818_vm2, %v1602_v29, 0.0 }
 0x2a3   :  { %v1616_v17 = vsel %vm818_vm2, %v1603_v16, 0.0 }
 0x2a4   :  { %v1609_v38 = vadd.f32 %v1608_v43, %v1607_v9  ;;  %v1618_v49 = vsel %vm818_vm2, %v1604_v60, 0.0 }
 0x2a6   :  { %v1611_v8 = vadd.f32 %v1610_v45, %v1609_v38  ;;  %v1729_v45 = vmul.f32 %v3882_v10, %v3809_v23 }
 0x2a8   :  { %v1613_v28 = vadd.f32 %v1612_v13, %v1611_v8  ;;  %v1730_v8 = vmul.f32 %v3884_v35, %v3804_v61 }
 0x2aa   :  { %v1615_v12 = vadd.f32 %v1614_v36, %v1613_v28  ;;  %v1737_v36 = vsel %vm818_vm2, %v1729_v45, 0.0 }
 0x2ac   :  { %v1617_v6 = vadd.f32 %v1616_v17, %v1615_v12  ;;  %v1738_v12 = vsel %vm818_vm2, %v1730_v8, 0.0 }
 0x2ae   :  { %v1619_v21 = vadd.f32 %v1618_v49, %v1617_v6  ;;  %v1731_v49 = vmul.f32 %v3886_v24, %v3811_v44 }
 0x2b0   :  { %1620 = vadd.xlane.f32.xlu1 %v1619_v21 }
 0x2b4   :  { %1493 = vadd.xlane.f32.xlu1 %v3571_v18 }
 0x2b8   :  { %1497 = vadd.xlane.f32.xlu1 %v3606_v52 }
 0x2bc   :  { %1501 = vadd.xlane.f32.xlu1 %v3623_v1 }
 0x2c0   :  { %1505 = vadd.xlane.f32.xlu1 %v3655_v47 }
 0x2c5   :  { %v1301_v3 = vpop.xlane.xlu1 %1300 }
 0x2c6   :  { %v1302_v34 = vrot.slane %v1301_v3, 4 }
 0x2c8   :  { %v1303_v48 = vadd.f32 %v1302_v34, %v1301_v3 }
 0x2c9   :  { %v1517_v51 = vpop.xlane.xlu1 %1516 }
 0x2ca   :  { %v1304_v40 = vrot.slane %v1303_v48, 2  ;;  %v1518_v59 = vrot.slane %v1517_v51, 4 }
 0x2cc   :  { %v1519_v14 = vadd.f32 %v1518_v59, %v1517_v51  ;;  %v1305_v9 = vadd.f32 %v1304_v40, %v1303_v48  ;;  %v1739_v40 = vadd.f32 %v1738_v12, %v1737_v36 }
 0x2cd   :  { %v1276_v52 = vpop.xlane.xlu1 %1275 }
 0x2ce   :  { %v1520_v63 = vrot.slane %v1519_v14, 2  ;;  %v1306_v2 = vrot.slane %v1305_v9, 1  ;;  %v1291_v17 = vmul.f32 0.015625, %v1276_v52  ;;  %v4328_v52 = vsub.f32 %v3693_v62, %v3772_v55 }
 0x2d0   :  { %v1307_v37 = vadd.f32 %v1306_v2, %v1305_v9  ;;  %v1521_v31 = vadd.f32 %v1520_v63, %v1519_v14  ;;  %v4326_v14 = vsub.f32 %v3702_v58, %v3772_v55  ;;  %v4329_v58 = vsub.f32 %v3684_v41, %v3772_v55 }
 0x2d1   :  { %v1280_v1 = vpop.xlane.xlu1 %1279  ;;  %v4331_v41 = vsub.f32 %v3729_v7, %v3772_v55 }
 0x2d2   :  { %2454 = vpush %v1307_v37  ;;  %v1522_v18 = vrot.slane %v1521_v31, 1  ;;  %v1293_v21 = vmul.f32 0.015625, %v1280_v1  ;;  %v1732_v37 = vmul.f32 %v3888_v39, %v3818_v57 }
 0x2d4   :  { %v1523_v43 = vadd.f32 %v1522_v18, %v1521_v31  ;;  %v1740_v31 = vsel %vm818_vm2, %v1731_v49, 0.0  ;;  %v4327_v18 = vsub.f32 %v3680_v0, %v3772_v55  ;;  %v1322_v1 = vsub.f32 %v4328_v52, %v1293_v21 }
 0x2d5   :  { %v1284_v13 = vpop.xlane.xlu1 %1283 }
 0x2d6   :  { %2456 = vpush %v1523_v43  ;;  %v1295_v51 = vmul.f32 0.015625, %v1284_v13  ;;  %v1320_v43 = vsub.f32 %v4327_v18, %v1291_v17  ;;  %v1741_v13 = vadd.f32 %v1740_v31, %v1739_v40  ;;  %v1734_v18 = vmul.f32 %v3904_v22, %v3839_v56 }
 0x2d9   :  { %v1288_v59 = vpop.xlane.xlu1 %1287 }
 0x2da   :  { %v1297_v8 = vmul.f32 0.015625, %v1288_v59  ;;  %v4333_v59 = vsub.f32 %v3758_v27, %v3772_v55 }
 0x2f8   :  { %v1577_v38 = vpop.xlane.xlu0 %1576 }
 0x2f9   :  { %v1578_v47 = vrot.slane %v1577_v38, 4 }
 0x2fb   :  { %v1579_v29 = vadd.f32 %v1578_v47, %v1577_v38 }
 0x2fc   :  { %v1278_v16 = vpop.xlane.xlu0 %1277 }
 0x2fd   :  { %v1580_v28 = vrot.slane %v1579_v29, 2  ;;  %v1292_v3 = vmul.f32 0.015625, %v1278_v16 }
 0x2ff   :  { %v1581_v60 = vadd.f32 %v1580_v28, %v1579_v29  ;;  %v1321_v38 = vsub.f32 %v4329_v58, %v1292_v3  ;;  %v4330_v29 = vsub.f32 %v3719_v46, %v3772_v55  ;;  %v1733_v46 = vmul.f32 %v3893_v25, %v3824_v4 }
 0x300   :  { %v1282_v6 = vpop.xlane.xlu0 %1281 }
 0x301   :  { %v1294_v34 = vmul.f32 0.015625, %v1282_v6  ;;  %v1582_v48 = vrot.slane %v1581_v60, 1  ;;  %v1324_v45 = vsub.f32 %v4330_v29, %v1295_v51  ;;  %v1742_v6 = vsel %vm818_vm2, %v1732_v37, 0.0 }
 0x302   :  { %v1743_v40 = vadd.f32 %v1742_v6, %v1741_v13  ;;  %v1744_v52 = vsel %vm818_vm2, %v1733_v46, 0.0 }
 0x303   :  { %v1323_v9 = vsub.f32 %v4326_v14, %v1294_v34  ;;  %s2455_s15 = spop %2454  ;;  %v1583_v63 = vadd.f32 %v1582_v48, %v1581_v60  ;;  %v4332_v34 = vsub.f32 %v3738_v15, %v3772_v55 }
 0x304   :  { %s1311_s16 = smul.f32 0.015625, %s2455_s15  ;;  %v1286_v2 = vpop.xlane.xlu0 %1285  ;;  %v1745_v58 = vadd.f32 %v1744_v52, %v1743_v40 }
 0x305   :  { %v1296_v47 = vmul.f32 0.015625, %v1286_v2  ;;  %2458 = vpush %v1583_v63  ;;  %v1326_v48 = vsub.f32 %v4332_v34, %v1297_v8  ;;  %v1746_v34 = vsel %vm818_vm2, %v1734_v18, 0.0 }
 0x306   :  { %v1328_v16 = vstv %s1311_s16 }
 0x307   :  { %v3961_v28 = vadd.f32 %v1328_v16, %v1320_v43  ;;  %v3963_v0 = vadd.f32 %v1328_v16, %v1321_v38  ;;  %v3965_v60 = vadd.f32 %v1328_v16, %v1322_v1  ;;  %v3967_v62 = vadd.f32 %v1328_v16, %v1323_v9  ;;  %s3977_s17 = spop %2456 }
 0x308   :  { %v3969_v36 = vadd.f32 %v1328_v16, %v1324_v45  ;;  %v1325_v12 = vsub.f32 %v4331_v41, %v1296_v47  ;;  %v1290_v17 = vpop.xlane.xlu0 %1289  ;;  %s1527_s18 = smul.f32 0.015625, %s3977_s17  ;;  %v3998_v31 = vadd.f32 %v1328_v16, %v1326_v48  ;;  %v4334_v45 = vsub.f32 %v3550_v26, %v3734_v5 }
 0x309   :  { %v1298_v49 = vmul.f32 0.015625, %v1290_v17  ;;  %v1641_v21 = vmul.f32 %v3961_v28, %v3961_v28  ;;  %v1642_v3 = vmul.f32 %v3963_v0, %v3963_v0  ;;  %v1643_v7 = vmul.f32 %v3965_v60, %v3965_v60 }
 0x30a   :  { %v3988_v51 = vadd.f32 %v1328_v16, %v1325_v12  ;;  %v1644_v9 = vmul.f32 %v3967_v62, %v3967_v62  ;;  %v1645_v55 = vmul.f32 %v3969_v36, %v3969_v36  ;;  %v1790_v38 = vmul.f32 %v3961_v28, %v3809_v23 }
 0x30b   :  { %v1327_v14 = vsub.f32 %v4333_v59, %v1298_v49  ;;  %v1649_v63 = vsel %vm818_vm2, %v1641_v21, 0.0  ;;  %v1650_v2 = vsel %vm818_vm2, %v1642_v3, 0.0  ;;  %v1652_v27 = vsel %vm818_vm2, %v1643_v7, 0.0 }
 0x30c   :  { %v1492_v37 = vpop.xlane.xlu0 %1491  ;;  %v1651_v15 = vadd.f32 %v1650_v2, %v1649_v63  ;;  %v1791_v47 = vmul.f32 %v3963_v0, %v3804_v61  ;;  %v1646_v13 = vmul.f32 %v3988_v51, %v3988_v51  ;;  %v1654_v41 = vsel %vm818_vm2, %v1644_v9, 0.0 }
 0x30d   :  { %v1507_v43 = vmul.f32 0.015625, %v1492_v37  ;;  %v4010_v29 = vadd.f32 %v1328_v16, %v1327_v14  ;;  %v4018_v12 = vstv %s1527_s18  ;;  %v1647_v46 = vmul.f32 %v3998_v31, %v3998_v31 }
 0x30e   :  { %v1653_v1 = vadd.f32 %v1652_v27, %v1651_v15  ;;  %v1735_v16 = vmul.f32 %v3913_v11, %v3842_v32  ;;  %v1656_v21 = vsel %vm818_vm2, %v1645_v55, 0.0  ;;  %v1792_v3 = vmul.f32 %v3965_v60, %v3811_v44 }
 0x30f   :  { %v1536_v8 = vsub.f32 %v4334_v45, %v1507_v43  ;;  %v1798_v48 = vsel %vm818_vm2, %v1790_v38, 0.0  ;;  %v1799_v40 = vsel %vm818_vm2, %v1791_v47, 0.0  ;;  %v1648_v14 = vmul.f32 %v4010_v29, %v4010_v29 }
 0x310   :  { %v1496_v17 = vpop.xlane.xlu0 %1495  ;;  %v1655_v6 = vadd.f32 %v1654_v41, %v1653_v1  ;;  %v1658_v9 = vsel %vm818_vm2, %v1646_v13, 0.0  ;;  %v1747_v63 = vadd.f32 %v1746_v34, %v1745_v58  ;;  %v4335_v2 = vsub.f32 %v3576_v50, %v3734_v5 }
 0x311   :  { %v4025_v49 = vadd.f32 %v4018_v12, %v1536_v8  ;;  %v1509_v26 = vmul.f32 0.015625, %v1496_v17  ;;  %v1793_v43 = vmul.f32 %v3967_v62, %v3818_v57  ;;  %v1800_v55 = vadd.f32 %v1799_v40, %v1798_v48 }
 0x312   :  { %v1657_v7 = vadd.f32 %v1656_v21, %v1655_v6  ;;  %v1660_v27 = vsel %vm818_vm2, %v1647_v46, 0.0  ;;  %v1801_v52 = vsel %vm818_vm2, %v1792_v3, 0.0  ;;  %v1736_v50 = vmul.f32 %v3918_v20, %v3853_v54 }
 0x313   :  { %v4035_v59 = vmul.f32 %v4025_v49, %v3961_v28  ;;  %v1538_v37 = vsub.f32 %v4335_v2, %v1509_v26  ;;  %v1802_v47 = vadd.f32 %v1801_v52, %v1800_v55  ;;  %v1748_v45 = vsel %vm818_vm2, %v1735_v16, 0.0 }
 0x314   :  { %v1500_v15 = vpop.xlane.xlu0 %1499  ;;  %v1659_v18 = vadd.f32 %v1658_v9, %v1657_v7  ;;  %v1794_v8 = vmul.f32 %v3969_v36, %v3824_v4  ;;  %v1662_v17 = vsel %vm818_vm2, %v1648_v14, 0.0  ;;  %v1749_v46 = vadd.f32 %v1748_v45, %v1747_v63 }
 0x315   :  { %v4048_v1 = vadd.f32 %v4018_v12, %v1538_v37  ;;  %v1511_v58 = vmul.f32 0.015625, %v1500_v15  ;;  %v1803_v6 = vsel %vm818_vm2, %v1793_v43, 0.0  ;;  %v1795_v3 = vmul.f32 %v3988_v51, %v3839_v56 }
 0x316   :  { %v1661_v38 = vadd.f32 %v1660_v27, %v1659_v18  ;;  %v1804_v7 = vadd.f32 %v1803_v6, %v1802_v47  ;;  %v4336_v16 = vsub.f32 %v3598_v30, %v3734_v5  ;;  %v1750_v48 = vsel %vm818_vm2, %v1736_v50, 0.0 }
 0x317   :  { %v4057_v13 = vmul.f32 %v4048_v1, %v3965_v60  ;;  %v1796_v40 = vmul.f32 %v3998_v31, %v3842_v32  ;;  %v1805_v14 = vsel %vm818_vm2, %v1794_v8, 0.0  ;;  %v4337_v9 = vsub.f32 %v3626_v42, %v3734_v5 }
 0x318   :  { %v1504_v41 = vpop.xlane.xlu0 %1503  ;;  %v1663_v21 = vadd.f32 %v1662_v17, %v1661_v38  ;;  %v1540_v34 = vsub.f32 %v4336_v16, %v1511_v58  ;;  %v1806_v2 = vadd.f32 %v1805_v14, %v1804_v7  ;;  %v1912_v37 = vmul.f32 %v3961_v28, %v3882_v10 }
 0x319   :  { %v1513_v26 = vmul.f32 0.015625, %v1504_v41  ;;  %v1913_v30 = vmul.f32 %v3963_v0, %v3884_v35  ;;  %v1751_v15 = vadd.f32 %v1750_v48, %v1749_v46  ;;  %v1807_v18 = vsel %vm818_vm2, %v1795_v3, 0.0 }
 0x31a   :  { %1664 = vadd.xlane.f32.xlu0 %v1663_v21  ;;  %v1808_v43 = vadd.f32 %v1807_v18, %v1806_v2  ;;  %v1914_v55 = vmul.f32 %v3965_v60, %v3886_v24  ;;  %v1549_v27 = vadd.f32 %v4018_v12, %v1540_v34  ;;  %v1809_v42 = vsel %vm818_vm2, %v1796_v40, 0.0 }
 0x31b   :  { %v1542_v63 = vsub.f32 %v4337_v9, %v1513_v26  ;;  %v1915_v52 = vmul.f32 %v3967_v62, %v3888_v39  ;;  %v1920_v47 = vsel %vm818_vm2, %v1912_v37, 0.0  ;;  %v1921_v58 = vsel %vm818_vm2, %v1913_v30, 0.0 }
 0x31c   :  { %v4085_v38 = vadd.f32 %v1809_v42, %v1808_v43  ;;  %v1922_v50 = vadd.f32 %v1921_v58, %v1920_v47  ;;  %v1916_v60 = vmul.f32 %v3969_v36, %v3893_v25  ;;  %v1923_v45 = vsel %vm818_vm2, %v1914_v55, 0.0 }
 0x31d   :  { %v1551_v28 = vadd.f32 %v4018_v12, %v1542_v63  ;;  %v4093_v41 = vmul.f32 %v1549_v27, %v3969_v36  ;;  %v1917_v17 = vmul.f32 %v3988_v51, %v3904_v22  ;;  %v1925_v46 = vsel %vm818_vm2, %v1915_v52, 0.0 }
 0x31e   :  { %1752 = vadd.xlane.f32.xlu0 %v1751_v15  ;;  %v1924_v8 = vadd.f32 %v1923_v45, %v1922_v50  ;;  %v1918_v21 = vmul.f32 %v3998_v31, %v3913_v11  ;;  %v1927_v3 = vsel %vm818_vm2, %v1916_v60, 0.0  ;;  %v1685_v63 = vmul.f32 %v4025_v49, %v4025_v49 }
 0x31f   :  { %v4099_v6 = vmul.f32 %v1551_v28, %v3998_v31  ;;  %v1929_v16 = vsel %vm818_vm2, %v1917_v17, 0.0  ;;  %v1851_v31 = vmul.f32 %v4025_v49, %v3809_v23  ;;  %v1973_v2 = vmul.f32 %v4025_v49, %v3882_v10 }
 0x320   :  { %v1926_v26 = vadd.f32 %v1925_v46, %v1924_v8  ;;  %v1931_v36 = vsel %vm818_vm2, %v1918_v21, 0.0  ;;  %v1687_v37 = vmul.f32 %v4048_v1, %v4048_v1  ;;  %v1853_v30 = vmul.f32 %v4048_v1, %v3811_v44 }
 0x321   :  { %v1975_v15 = vmul.f32 %v4048_v1, %v3886_v24  ;;  %v1855_v43 = vmul.f32 %v1549_v27, %v3824_v4  ;;  %v1689_v55 = vmul.f32 %v1549_v27, %v1549_v27  ;;  %v1977_v42 = vmul.f32 %v1549_v27, %v3893_v25 }
 0x322   :  { %v1928_v7 = vadd.f32 %v1927_v3, %v1926_v26  ;;  %v4125_v52 = vmul.f32 %v4010_v29, %v3853_v54  ;;  %v1857_v47 = vmul.f32 %v1551_v28, %v3842_v32  ;;  %v1859_v44 = vsel %vm818_vm2, %v1851_v31, 0.0 }
 0x323   :  { %v1862_v58 = vsel %vm818_vm2, %v1853_v30, 0.0  ;;  %v1693_v24 = vsel %vm818_vm2, %v1685_v63, 0.0  ;;  %v1696_v4 = vsel %vm818_vm2, %v1687_v37, 0.0  ;;  %v1981_v1 = vsel %vm818_vm2, %v1973_v2, 0.0 }
 0x324   :  { %v1930_v34 = vadd.f32 %v1929_v16, %v1928_v7  ;;  %v4338_v25 = vsub.f32 %v3556_v53, %v3734_v5  ;;  %v1866_v60 = vsel %vm818_vm2, %v1855_v43, 0.0  ;;  %v1984_v45 = vsel %vm818_vm2, %v1975_v15, 0.0 }
 0x325   :  { %v4138_v8 = vmul.f32 %v1551_v28, %v1551_v28  ;;  %v1700_v17 = vsel %vm818_vm2, %v1689_v55, 0.0  ;;  %v4142_v46 = vmul.f32 %v1551_v28, %v3913_v11  ;;  %v4145_v26 = vsel %vm818_vm2, %v1977_v42, 0.0 }
 0x326   :  { %v4106_v48 = vadd.f32 %v1931_v36, %v1930_v34  ;;  %v4149_v7 = vsel %vm818_vm2, %v1857_v47, 0.0  ;;  %v2042_v34 = vsel %vm818_vm2, %v4035_v59, 0.0  ;;  %v2045_v11 = vsel %vm818_vm2, %v4057_v13, 0.0 }
 0x336   :  { %s2459_s19 = spop %2458 }
 0x337   :  { %s1585_s20 = smul.f32 0.00024414063, %s2459_s19 }
 0x339   :  { %s1586_s22 = smax.f32 %s2645_s21, %s1585_s20 }
 0x33a   :  { %s1587_s23 = sadd.f32 1e-08, %s1586_s22 }
 0x33c   :  { %v1588_v40 = vstv %s1587_s23 }
 0x33d   :  { %2589 = vrsqrt.f32 %v1588_v40  ;;  %v1621_v14 = vpop.xlane.xlu1 %1620  ;;  %vm1591_vm5 = vcmp.eq.f32.partialorder %v1588_v40, inf  ;;  %vm1593_vm10 = vcmp.eq.f32.partialorder %v1588_v40, 0.0  ;;  %v1594_v30 = vand.u32 2147483648, %v1588_v40 }
 0x33e   :  { %v1622_v9 = vrot.slane %v1621_v14, 4 }
 0x340   :  { %v1623_v18 = vadd.f32 %v1622_v9, %v1621_v14  ;;  %v4339_v9 = vsub.f32 %v3586_v33, %v3734_v5  ;;  %v4340_v33 = vsub.f32 %v3609_v19, %v3734_v5 }
 0x341   :  { %v1494_v23 = vpop.xlane.xlu1 %1493 }
 0x342   :  { %v1624_v10 = vrot.slane %v1623_v18, 2  ;;  %v1508_v49 = vmul.f32 0.015625, %v1494_v23 }
 0x344   :  { %v1537_v27 = vsub.f32 %v4338_v25, %v1508_v49  ;;  %v1625_v50 = vadd.f32 %v1624_v10, %v1623_v18 }
 0x345   :  { %v1498_v32 = vpop.xlane.xlu1 %1497 }
 0x346   :  { %v1546_v21 = vadd.f32 %v4018_v12, %v1537_v27  ;;  %v1510_v53 = vmul.f32 0.015625, %v1498_v32  ;;  %v1626_v3 = vrot.slane %v1625_v50, 1 }
 0x347   :  { %v2590_v16 = vpop.eup %2589 }
 0x348   :  { %v1686_v28 = vmul.f32 %v1546_v21, %v1546_v21  ;;  %v1852_v36 = vmul.f32 %v1546_v21, %v3804_v61  ;;  %v1974_v14 = vmul.f32 %v1546_v21, %v3884_v35  ;;  %v2035_v31 = vmul.f32 %v1546_v21, %v3963_v0 }
 0x349   :  { %v1539_v63 = vsub.f32 %v4339_v9, %v1510_v53  ;;  %v1502_v2 = vpop.xlane.xlu1 %1501  ;;  %v1590_v37 = vmul.f32 %v2590_v16, %v1588_v40  ;;  %v1627_v15 = vadd.f32 %v1626_v3, %v1625_v50  ;;  %v4341_v16 = vld [vmem:[#allocation5_spill] sm:$0xff] }
 0x34a   :  { %v1512_v18 = vmul.f32 0.015625, %v1502_v2  ;;  %v1860_v59 = vsel %vm818_vm2, %v1852_v36, 0.0  ;;  %v1694_v13 = vsel %vm818_vm2, %v1686_v28, 0.0  ;;  %v1982_v43 = vsel %vm818_vm2, %v1974_v14, 0.0 }
 0x34b   :  { %v1548_v61 = vadd.f32 %v4018_v12, %v1539_v63  ;;  %v1592_v35 = vsel %vm1591_vm5, %v1588_v40, %v1590_v37  ;;  %v1861_v0 = vadd.f32 %v1860_v59, %v1859_v44  ;;  %v1695_v23 = vadd.f32 %v1694_v13, %v1693_v24 }
 0x34c   :  { %v1541_v55 = vsub.f32 %v4340_v33, %v1512_v18  ;;  %v1595_v42 = vsel %vm1593_vm10, %v1594_v30, %v1592_v35  ;;  %v1983_v10 = vadd.f32 %v1982_v43, %v1981_v1  ;;  %v2043_v49 = vsel %vm818_vm2, %v2035_v31, 0.0 }
 0x34d   :  { %2460 = vpush %v1595_v42  ;;  %v1506_v47 = vpop.xlane.xlu1 %1505  ;;  %v1854_v25 = vmul.f32 %v1548_v61, %v3818_v57  ;;  %v1863_v27 = vadd.f32 %v1862_v58, %v1861_v0  ;;  %v1688_v50 = vmul.f32 %v1548_v61, %v1548_v61  ;;  %v1697_v32 = vadd.f32 %v1696_v4, %v1695_v23 }
 0x34e   :  { %v1550_v21 = vadd.f32 %v4018_v12, %v1541_v55  ;;  %2462 = vpush %v1627_v15  ;;  %v1514_v44 = vmul.f32 0.015625, %v1506_v47  ;;  %v1976_v24 = vmul.f32 %v1548_v61, %v3888_v39  ;;  %v1985_v19 = vadd.f32 %v1984_v45, %v1983_v10 }
 0x34f   :  { %v1864_v40 = vsel %vm818_vm2, %v1854_v25, 0.0  ;;  %v1698_v1 = vsel %vm818_vm2, %v1688_v50, 0.0  ;;  %v2037_v53 = vmul.f32 %v1548_v61, %v3967_v62  ;;  %v2044_v3 = vadd.f32 %v2043_v49, %v2042_v34 }
 0x350   :  { %v4342_v57 = vsub.f32 %v4341_v16, %v3734_v5  ;;  %v1856_v4 = vmul.f32 %v1550_v21, %v3839_v56  ;;  %v1865_v28 = vadd.f32 %v1864_v40, %v1863_v27  ;;  %v1690_v36 = vmul.f32 %v1550_v21, %v1550_v21 }
 0x351   :  { %v1699_v14 = vadd.f32 %v1698_v1, %v1697_v32  ;;  %v1978_v31 = vmul.f32 %v1550_v21, %v3904_v22  ;;  %v1986_v39 = vsel %vm818_vm2, %v1976_v24, 0.0  ;;  %v2039_v45 = vmul.f32 %v1550_v21, %v3988_v51 }
 0x352   :  { %v1543_v58 = vsub.f32 %v4342_v57, %v1514_v44  ;;  %v1867_v63 = vadd.f32 %v1866_v60, %v1865_v28  ;;  %v1868_v62 = vsel %vm818_vm2, %v1856_v4, 0.0  ;;  %v1702_v34 = vsel %vm818_vm2, %v1690_v36, 0.0 }
 0x353   :  { %v1701_v5 = vadd.f32 %v1700_v17, %v1699_v14  ;;  %v1987_v2 = vadd.f32 %v1986_v39, %v1985_v19  ;;  %v1990_v56 = vsel %vm818_vm2, %v1978_v31, 0.0  ;;  %v2046_v37 = vadd.f32 %v2045_v11, %v2044_v3 }
 0x354   :  { %v1552_v9 = vadd.f32 %v4018_v12, %v1543_v58  ;;  %v1869_v15 = vadd.f32 %v1868_v62, %v1867_v63  ;;  %v1704_v51 = vsel %vm818_vm2, %v4138_v8, 0.0  ;;  %v2047_v60 = vsel %vm818_vm2, %v2037_v53, 0.0 }
 0x355   :  { %v1703_v59 = vadd.f32 %v1702_v34, %v1701_v5  ;;  %v1989_v12 = vadd.f32 %v4145_v26, %v1987_v2  ;;  %v2048_v35 = vadd.f32 %v2047_v60, %v2046_v37  ;;  %v2049_v0 = vsel %vm818_vm2, %v4093_v41, 0.0 }
 0x356   :  { %v1858_v30 = vmul.f32 %v1552_v9, %v3853_v54  ;;  %v1692_v22 = vmul.f32 %v1552_v9, %v1552_v9  ;;  %v1980_v18 = vmul.f32 %v1552_v9, %v3918_v20  ;;  %v1871_v17 = vadd.f32 %v4149_v7, %v1869_v15 }
 0x357   :  { %v1992_v54 = vsel %vm818_vm2, %v4142_v46, 0.0  ;;  %v1705_v43 = vadd.f32 %v1704_v51, %v1703_v59  ;;  %v1991_v61 = vadd.f32 %v1990_v56, %v1989_v12  ;;  %v2041_v23 = vmul.f32 %v1552_v9, %v4010_v29 }
 0x358   :  { %v1872_v13 = vsel %vm818_vm2, %v1858_v30, 0.0  ;;  %v1706_v11 = vsel %vm818_vm2, %v1692_v22, 0.0  ;;  %v1994_v26 = vsel %vm818_vm2, %v1980_v18, 0.0  ;;  %v2051_v7 = vsel %vm818_vm2, %v2039_v45, 0.0 }
 0x359   :  { %v1873_v8 = vadd.f32 %v1872_v13, %v1871_v17  ;;  %v1707_v33 = vadd.f32 %v1706_v11, %v1705_v43  ;;  %v1993_v55 = vadd.f32 %v1992_v54, %v1991_v61  ;;  %v2050_v42 = vadd.f32 %v2049_v0, %v2048_v35 }
 0x35a   :  { %v1811_v49 = vsel %vm818_vm2, %v4125_v52, 0.0  ;;  %v1919_v41 = vmul.f32 %v4010_v29, %v3918_v20  ;;  %v2053_v47 = vsel %vm818_vm2, %v4099_v6, 0.0  ;;  %v2055_v25 = vsel %vm818_vm2, %v2041_v23, 0.0 }
 0x35b   :  { %1874 = vadd.xlane.f32.xlu0 %v1873_v8  ;;  %1708 = vadd.xlane.f32.xlu1 %v1707_v33  ;;  %v1995_v10 = vadd.f32 %v1994_v26, %v1993_v55  ;;  %v2052_v46 = vadd.f32 %v2051_v7, %v2050_v42  ;;  %v1812_v27 = vadd.f32 %v1811_v49, %v4085_v38 }
 0x35c   :  { %v1933_v21 = vsel %vm818_vm2, %v1919_v41, 0.0 }
 0x35d   :  { %v2054_v50 = vadd.f32 %v2053_v47, %v2052_v46  ;;  %v1934_v44 = vadd.f32 %v1933_v21, %v4106_v48 }
 0x35f   :  { %1996 = vadd.xlane.f32.xlu0 %v1995_v10  ;;  %1813 = vadd.xlane.f32.xlu1 %v1812_v27  ;;  %v2056_v32 = vadd.f32 %v2055_v25, %v2054_v50 }
 0x363   :  { %1935 = vadd.xlane.f32.xlu1 %v1934_v44 }
 0x367   :  { %2057 = vadd.xlane.f32.xlu1 %v2056_v32 }
 0x37e   :  { %s4214_s24 = spop %2460 }
 0x37f   :  { %s2463_s25 = spop %2462 }
 0x380   :  { %s1629_s26 = smul.f32 0.00024414063, %s2463_s25 }
 0x382   :  { %s1630_s27 = smax.f32 %s2645_s21, %s1629_s26 }
 0x383   :  { %s1631_s28 = sadd.f32 1e-08, %s1630_s27 }
 0x385   :  { %v1632_v20 = vstv %s1631_s28 }
 0x386   :  { %2591 = vrsqrt.f32 %v1632_v20  ;;  %vm1635_vm11 = vcmp.eq.f32.partialorder %v1632_v20, inf  ;;  %v1638_v6 = vand.u32 2147483648, %v1632_v20  ;;  %vm1637_vm12 = vcmp.eq.f32.partialorder %v1632_v20, 0.0 }
 0x390   :  { %v2592_v29 = vpop.eup %2591 }
 0x391   :  { %v1634_v38 = vmul.f32 %v2592_v29, %v1632_v20 }
 0x393   :  { %v1636_v52 = vsel %vm1635_vm11, %v1632_v20, %v1634_v38 }
 0x394   :  { %v1639_v24 = vsel %vm1637_vm12, %v1638_v6, %v1636_v52 }
 0x395   :  { %2464 = vpush %v1639_v24 }
 0x3a7   :  { %v1665_v48 = vpop.xlane.xlu0 %1664 }
 0x3a8   :  { %v1666_v19 = vrot.slane %v1665_v48, 4 }
 0x3aa   :  { %v1667_v40 = vadd.f32 %v1666_v19, %v1665_v48 }
 0x3ab   :  { %v1753_v5 = vpop.xlane.xlu0 %1752 }
 0x3ac   :  { %v1668_v1 = vrot.slane %v1667_v40, 2  ;;  %v1754_v2 = vrot.slane %v1753_v5, 4 }
 0x3ae   :  { %v1669_v53 = vadd.f32 %v1668_v1, %v1667_v40  ;;  %v1755_v56 = vadd.f32 %v1754_v2, %v1753_v5 }
 0x3b0   :  { %v1670_v3 = vrot.slane %v1669_v53, 1  ;;  %v1756_v30 = vrot.slane %v1755_v56, 2 }
 0x3b2   :  { %v1671_v16 = vadd.f32 %v1670_v3, %v1669_v53  ;;  %v1757_v15 = vadd.f32 %v1756_v30, %v1755_v56 }
 0x3b4   :  { %2466 = vpush %v1671_v16  ;;  %v1758_v18 = vrot.slane %v1757_v15, 1 }
 0x3b6   :  { %v1759_v17 = vadd.f32 %v1758_v18, %v1757_v15 }
 0x3c6   :  { %s4217_s29 = spop %2464 }
 0x3c7   :  { %s1773_s10 = smul.f32 %s4217_s29, %s4214_s24 }
 0x3c9   :  { %s1774_s11 = smax.f32 %s2645_s21, %s1773_s10 }
 0x3ca   :  { %v1775_v13 = vstv %s1774_s11 }
 0x3cb   :  { %vm1778_vm0 = vcmp.eq.f32.partialorder %v1775_v13, inf  ;;  %v1781_v23 = vand.u32 2147483648, %v1775_v13  ;;  %vm1780_vm4 = vcmp.eq.f32.partialorder %v1775_v13, 0.0 }
 0x3e5   :  { %s2467_s30 = spop %2466 }
 0x3e6   :  { %s1673_s2 = smul.f32 0.00024414063, %s2467_s30 }
 0x3e8   :  { %v1709_v57 = vpop.xlane.xlu1 %1708  ;;  %s1674_s3 = smax.f32 %s2645_s21, %s1673_s2  ;;  %v1875_v40 = vpop.xlane.xlu0 %1874 }
 0x3e9   :  { %v1710_v58 = vrot.slane %v1709_v57, 4  ;;  %s1675_s4 = sadd.f32 1e-08, %s1674_s3  ;;  %v1876_v1 = vrot.slane %v1875_v40, 4 }
 0x3eb   :  { %v1711_v4 = vadd.f32 %v1710_v58, %v1709_v57  ;;  %v1676_v28 = vstv %s1675_s4  ;;  %v1877_v53 = vadd.f32 %v1876_v1, %v1875_v40 }
 0x3ec   :  { %2593 = vrsqrt.f32 %v1676_v28  ;;  %vm1679_vm2 = vcmp.eq.f32.partialorder %v1676_v28, inf  ;;  %v1682_v9 = vand.u32 2147483648, %v1676_v28  ;;  %vm1681_vm13 = vcmp.eq.f32.partialorder %v1676_v28, 0.0  ;;  %v1814_v55 = vpop.xlane.xlu1 %1813 }
 0x3ed   :  { %v1712_v36 = vrot.slane %v1711_v4, 2  ;;  %v1815_v42 = vrot.slane %v1814_v55, 4  ;;  %v1878_v3 = vrot.slane %v1877_v53, 2 }
 0x3ef   :  { %v1713_v14 = vadd.f32 %v1712_v36, %v1711_v4  ;;  %v1816_v10 = vadd.f32 %v1815_v42, %v1814_v55  ;;  %v1879_v57 = vadd.f32 %v1878_v3, %v1877_v53 }
 0x3f1   :  { %v1714_v39 = vrot.slane %v1713_v14, 1  ;;  %v1817_v46 = vrot.slane %v1816_v10, 2  ;;  %v1880_v58 = vrot.slane %v1879_v57, 1 }
 0x3f3   :  { %v1715_v34 = vadd.f32 %v1714_v39, %v1713_v14  ;;  %v1818_v41 = vadd.f32 %v1817_v46, %v1816_v10 }
 0x3f5   :  { %v1819_v47 = vrot.slane %v1818_v41, 1 }
 0x3f6   :  { %v2594_v31 = vpop.eup %2593 }
 0x3f7   :  { %v1678_v45 = vmul.f32 %v2594_v31, %v1676_v28  ;;  %v1820_v27 = vadd.f32 %v1819_v47, %v1818_v41 }
 0x3f9   :  { %v1680_v63 = vsel %vm1679_vm2, %v1676_v28, %v1678_v45  ;;  %v1881_v28 = vadd.f32 %v1880_v58, %v1879_v57 }
 0x3fa   :  { %v1683_v62 = vsel %vm1681_vm13, %v1682_v9, %v1680_v63 }
 0x3fb   :  { %2468 = vpush %v1683_v62 }
 0x3fc   :  { %2470 = vpush %v1715_v34 }
 0x42c   :  { %s4220_s5 = spop %2468 }
 0x42d   :  { %s2471_s6 = spop %2470  ;;  %s1834_s19 = smul.f32 %s4220_s5, %s4214_s24 }
 0x42e   :  { %s1717_s7 = smul.f32 0.00024414063, %s2471_s6 }
 0x42f   :  { %s1835_s20 = smax.f32 %s2645_s21, %s1834_s19 }
 0x430   :  { %s1718_s8 = smax.f32 %s2645_s21, %s1717_s7  ;;  %v1836_v50 = vstv %s1835_s20 }
 0x431   :  { %s1719_s9 = sadd.f32 1e-08, %s1718_s8  ;;  %vm1839_vm6 = vcmp.eq.f32.partialorder %v1836_v50, inf  ;;  %v1842_v24 = vand.u32 2147483648, %v1836_v50  ;;  %vm1841_vm9 = vcmp.eq.f32.partialorder %v1836_v50, 0.0 }
 0x433   :  { %v1720_v37 = vstv %s1719_s9 }
 0x434   :  { %2595 = vrsqrt.f32 %v1720_v37  ;;  %vm1723_vm14 = vcmp.eq.f32.partialorder %v1720_v37, inf  ;;  %v1726_v51 = vand.u32 2147483648, %v1720_v37  ;;  %vm1725_vm15 = vcmp.eq.f32.partialorder %v1720_v37, 0.0 }
 0x435   :  { %2597 = vrsqrt.f32 %v1775_v13 }
 0x43e   :  { %v2596_v22 = vpop.eup %2595 }
 0x43f   :  { %v1722_v59 = vmul.f32 %v2596_v22, %v1720_v37  ;;  %v2598_v54 = vpop.eup %2597 }
 0x440   :  { %v1777_v43 = vmul.f32 %v2598_v54, %v1775_v13 }
 0x441   :  { %v1724_v12 = vsel %vm1723_vm14, %v1720_v37, %v1722_v59  ;;  %v1936_v37 = vpop.xlane.xlu1 %1935 }
 0x442   :  { %v1727_v60 = vsel %vm1725_vm15, %v1726_v51, %v1724_v12  ;;  %v1779_v8 = vsel %vm1778_vm0, %v1775_v13, %v1777_v43  ;;  %v1937_v30 = vrot.slane %v1936_v37, 4 }
 0x443   :  { %2472 = vpush %v1727_v60  ;;  %v1782_v33 = vsel %vm1780_vm4, %v1781_v23, %v1779_v8 }
 0x444   :  { %2474 = vpush %v1759_v17  ;;  %v1938_v15 = vadd.f32 %v1937_v30, %v1936_v37 }
 0x446   :  { %v1939_v22 = vrot.slane %v1938_v15, 2 }
 0x448   :  { %v1940_v59 = vadd.f32 %v1939_v22, %v1938_v15 }
 0x44a   :  { %v1941_v51 = vrot.slane %v1940_v59, 1 }
 0x44c   :  { %v1942_v60 = vadd.f32 %v1941_v51, %v1940_v59 }
 0x474   :  { %s4226_s0 = spop %2472 }
 0x475   :  { %s2475_s12 = spop %2474  ;;  %s1895_s3 = smul.f32 %s4226_s0, %s4214_s24 }
 0x476   :  { %s1761_s13 = smul.f32 0.00024414063, %s2475_s12 }
 0x477   :  { %s1896_s4 = smax.f32 %s2645_s21, %s1895_s3 }
 0x478   :  { %s1762_s14 = smax.f32 %s2645_s21, %s1761_s13  ;;  %v1897_v36 = vstv %s1896_s4 }
 0x479   :  { %s1763_s15 = sadd.f32 1e-08, %s1762_s14  ;;  %vm1900_vm5 = vcmp.eq.f32.partialorder %v1897_v36, inf  ;;  %v1903_v5 = vand.u32 2147483648, %v1897_v36  ;;  %vm1902_vm12 = vcmp.eq.f32.partialorder %v1897_v36, 0.0 }
 0x47b   :  { %v1764_v11 = vstv %s1763_s15 }
 0x47c   :  { %2599 = vrsqrt.f32 %v1764_v11  ;;  %vm1767_vm1 = vcmp.eq.f32.partialorder %v1764_v11, inf  ;;  %v1770_v0 = vand.u32 2147483648, %v1764_v11  ;;  %vm1769_vm3 = vcmp.eq.f32.partialorder %v1764_v11, 0.0 }
 0x486   :  { %v2600_v61 = vpop.eup %2599 }
 0x487   :  { %v1766_v35 = vmul.f32 %v2600_v61, %v1764_v11 }
 0x489   :  { %v1768_v26 = vsel %vm1767_vm1, %v1764_v11, %v1766_v35 }
 0x48a   :  { %v1771_v7 = vsel %vm1769_vm3, %v1770_v0, %v1768_v26 }
 0x48b   :  { %2476 = vpush %v1771_v7 }
 0x48c   :  { %2478 = vpush %v1782_v33  ;;  %v1997_v33 = vpop.xlane.xlu0 %1996 }
 0x48d   :  { %v1998_v55 = vrot.slane %v1997_v33, 4 }
 0x48f   :  { %v1999_v42 = vadd.f32 %v1998_v55, %v1997_v33 }
 0x491   :  { %v2000_v10 = vrot.slane %v1999_v42, 2 }
 0x4bc   :  { %s4229_s16 = spop %2476 }
 0x4bd   :  { %s2479_s17 = spop %2478 }
 0x4be   :  { %s1784_s18 = sadd.f32 1e-10, %s2479_s17 }
 0x4c0   :  { %v1785_v49 = vstv %s1784_s18 }
 0x4c1   :  { %2601 = vrcp.f32 %v1785_v49  ;;  %v2001_v49 = vadd.f32 %v2000_v10, %v1999_v42 }
 0x4c2   :  { %2603 = vrsqrt.f32 %v1836_v50 }
 0x4c3   :  { %v2002_v41 = vrot.slane %v2001_v49, 1 }
 0x4cb   :  { %v2602_v25 = vpop.eup %2601 }
 0x4cc   :  { %2480 = vpush %v2602_v25  ;;  %v2604_v21 = vpop.eup %2603  ;;  %v2003_v25 = vadd.f32 %v2002_v41, %v2001_v49 }
 0x4cd   :  { %2482 = vpush %v1820_v27  ;;  %v1838_v44 = vmul.f32 %v2604_v21, %v1836_v50 }
 0x4cf   :  { %v1840_v6 = vsel %vm1839_vm6, %v1836_v50, %v1838_v44 }
 0x4d0   :  { %v1843_v19 = vsel %vm1841_vm9, %v1842_v24, %v1840_v6 }
 0x4fd   :  { %s4234_s22 = spop %2480 }
 0x4fe   :  { %s2483_s23 = spop %2482  ;;  %s1788_s6 = smul.f32 %s4234_s22, %s4229_s16 }
 0x4ff   :  { %s1822_s25 = smul.f32 0.00024414063, %s2483_s23 }
 0x500   :  { %s1956_s16 = smul.f32 %s4220_s5, %s4217_s29 }
 0x501   :  { %s1823_s26 = smax.f32 %s2645_s21, %s1822_s25 }
 0x502   :  { %s1824_s27 = sadd.f32 1e-08, %s1823_s26  ;;  %s1957_s17 = smax.f32 %s2645_s21, %s1956_s16 }
 0x503   :  { %v1958_v17 = vstv %s1957_s17 }
 0x504   :  { %v1825_v32 = vstv %s1824_s27  ;;  %vm1961_vm2 = vcmp.eq.f32.partialorder %v1958_v17, inf  ;;  %v1964_v26 = vand.u32 2147483648, %v1958_v17  ;;  %vm1963_vm15 = vcmp.eq.f32.partialorder %v1958_v17, 0.0 }
 0x505   :  { %2605 = vrsqrt.f32 %v1825_v32  ;;  %vm1828_vm7 = vcmp.eq.f32.partialorder %v1825_v32, inf  ;;  %v1831_v38 = vand.u32 2147483648, %v1825_v32  ;;  %vm1830_vm8 = vcmp.eq.f32.partialorder %v1825_v32, 0.0 }
 0x50f   :  { %v2606_v20 = vpop.eup %2605 }
 0x510   :  { %v1827_v29 = vmul.f32 %v2606_v20, %v1825_v32 }
 0x512   :  { %v1829_v52 = vsel %vm1828_vm7, %v1825_v32, %v1827_v29 }
 0x513   :  { %v1832_v48 = vsel %vm1830_vm8, %v1831_v38, %v1829_v52 }
 0x514   :  { %2484 = vpush %v1832_v48 }
 0x515   :  { %2486 = vpush %v1843_v19  ;;  %v2058_v19 = vpop.xlane.xlu1 %2057 }
 0x516   :  { %v2059_v40 = vrot.slane %v2058_v19, 4 }
 0x518   :  { %v2060_v1 = vadd.f32 %v2059_v40, %v2058_v19 }
 0x51a   :  { %v2061_v53 = vrot.slane %v2060_v1, 2 }
 0x545   :  { %s2485_s28 = spop %2484 }
 0x546   :  { %s2487_s30 = spop %2486 }
 0x547   :  { %s1845_s2 = sadd.f32 1e-10, %s2487_s30 }
 0x549   :  { %v1846_v16 = vstv %s1845_s2  ;;  %s2017_s2 = smul.f32 %s4226_s0, %s4217_s29 }
 0x54a   :  { %2607 = vrcp.f32 %v1846_v16  ;;  %v2062_v16 = vadd.f32 %v2061_v53, %v2060_v1 }
 0x54b   :  { %2609 = vrsqrt.f32 %v1897_v36  ;;  %s2018_s3 = smax.f32 %s2645_s21, %s2017_s2 }
 0x54c   :  { %v2019_v27 = vstv %s2018_s3  ;;  %v2063_v57 = vrot.slane %v2062_v16, 1  ;;  %s2633_s3 = scalar_lea.hbm %s4280_s1, 16 }
 0x54d   :  { %vm2022_vm0 = vcmp.eq.f32.partialorder %v2019_v27, inf  ;;  %v2025_v52 = vand.u32 2147483648, %v2019_v27  ;;  %vm2024_vm4 = vcmp.eq.f32.partialorder %v2019_v27, 0.0  ;;  %p2634_p0 = scmp.ne.s32.totalorder %s4280_s1, %s2633_s3  ;;  %p2637_p1 = scmp.lt.u32.totalorder %s2633_s3, %s4280_s1 }
 0x54f   :  { %p2639_p2 = pnand %p2637_p1, %p2634_p0 }
 0x554   :  { %v2608_v4 = vpop.eup %2607 }
 0x555   :  { %2488 = vpush %v2608_v4  ;;  %v2610_v31 = vpop.eup %2609  ;;  %v2064_v4 = vadd.f32 %v2063_v57, %v2062_v16 }
 0x556   :  { %2490 = vpush %v1881_v28  ;;  %v1899_v39 = vmul.f32 %v2610_v31, %v1897_v36 }
 0x558   :  { %v1901_v62 = vsel %vm1900_vm5, %v1897_v36, %v1899_v39 }
 0x559   :  { %v1904_v56 = vsel %vm1902_vm12, %v1903_v5, %v1901_v62 }
 0x586   :  { %s2489_s7 = spop %2488 }
 0x587   :  { %s1849_s8 = smul.f32 %s2489_s7, %s2485_s28  ;;  %s2491_s9 = spop %2490 }
 0x588   :  { %s1883_s10 = smul.f32 0.00024414063, %s2491_s9 }
 0x589   :  { %s4242_s11 = sadd.f32 %s1849_s8, %s1788_s6 }
 0x58a   :  { %s1884_s12 = smax.f32 %s2645_s21, %s1883_s10 }
 0x58b   :  { %s1885_s13 = sadd.f32 1e-08, %s1884_s12 }
 0x58d   :  { %v1886_v14 = vstv %s1885_s13 }
 0x58e   :  { %2611 = vrsqrt.f32 %v1886_v14  ;;  %vm1889_vm10 = vcmp.eq.f32.partialorder %v1886_v14, inf  ;;  %v1892_v63 = vand.u32 2147483648, %v1886_v14  ;;  %vm1891_vm11 = vcmp.eq.f32.partialorder %v1886_v14, 0.0 }
 0x598   :  { %v2612_v45 = vpop.eup %2611 }
 0x599   :  { %v1888_v9 = vmul.f32 %v2612_v45, %v1886_v14 }
 0x59b   :  { %v1890_v34 = vsel %vm1889_vm10, %v1886_v14, %v1888_v9 }
 0x59c   :  { %v1893_v2 = vsel %vm1891_vm11, %v1892_v63, %v1890_v34 }
 0x59d   :  { %2492 = vpush %v1893_v2 }
 0x59e   :  { %2494 = vpush %v1904_v56 }
 0x5ce   :  { %s2493_s24 = spop %2492 }
 0x5cf   :  { %s2495_s14 = spop %2494 }
 0x5d0   :  { %s1906_s15 = sadd.f32 1e-10, %s2495_s14 }
 0x5d2   :  { %v1907_v18 = vstv %s1906_s15 }
 0x5d3   :  { %2613 = vrcp.f32 %v1907_v18 }
 0x5d4   :  { %2615 = vrsqrt.f32 %v1958_v17 }
 0x5dd   :  { %v2614_v12 = vpop.eup %2613 }
 0x5de   :  { %2496 = vpush %v2614_v12  ;;  %v2616_v11 = vpop.eup %2615 }
 0x5df   :  { %2498 = vpush %v1942_v60  ;;  %v1960_v54 = vmul.f32 %v2616_v11, %v1958_v17 }
 0x5e1   :  { %v1962_v0 = vsel %vm1961_vm2, %v1958_v17, %v1960_v54 }
 0x5e2   :  { %v1965_v7 = vsel %vm1963_vm15, %v1964_v26, %v1962_v0 }
 0x60f   :  { %s2497_s18 = spop %2496 }
 0x610   :  { %s1910_s19 = smul.f32 %s2497_s18, %s2493_s24  ;;  %s2499_s20 = spop %2498 }
 0x611   :  { %s1944_s22 = smul.f32 0.00024414063, %s2499_s20 }
 0x612   :  { %s4249_s23 = sadd.f32 %s1910_s19, %s4242_s11  ;;  %s2078_s24 = smul.f32 %s4226_s0, %s4220_s5 }
 0x613   :  { %s1945_s25 = smax.f32 %s2645_s21, %s1944_s22 }
 0x614   :  { %s1946_s26 = sadd.f32 1e-08, %s1945_s25  ;;  %s2079_s14 = smax.f32 %s2645_s21, %s2078_s24 }
 0x615   :  { %v2080_v28 = vstv %s2079_s14 }
 0x616   :  { %v1947_v13 = vstv %s1946_s26  ;;  %vm2083_vm6 = vcmp.eq.f32.partialorder %v2080_v28, inf  ;;  %v2086_v34 = vand.u32 2147483648, %v2080_v28  ;;  %vm2085_vm9 = vcmp.eq.f32.partialorder %v2080_v28, 0.0 }
 0x617   :  { %2617 = vrsqrt.f32 %v1947_v13  ;;  %vm1950_vm13 = vcmp.eq.f32.partialorder %v1947_v13, inf  ;;  %v1953_v35 = vand.u32 2147483648, %v1947_v13  ;;  %vm1952_vm14 = vcmp.eq.f32.partialorder %v1947_v13, 0.0 }
 0x621   :  { %v2618_v43 = vpop.eup %2617 }
 0x622   :  { %v1949_v61 = vmul.f32 %v2618_v43, %v1947_v13 }
 0x624   :  { %v1951_v8 = vsel %vm1950_vm13, %v1947_v13, %v1949_v61 }
 0x625   :  { %v1954_v23 = vsel %vm1952_vm14, %v1953_v35, %v1951_v8 }
 0x626   :  { %2500 = vpush %v1954_v23 }
 0x627   :  { %2502 = vpush %v1965_v7 }
 0x657   :  { %s2501_s27 = spop %2500 }
 0x658   :  { %s2503_s28 = spop %2502 }
 0x659   :  { %s1967_s30 = sadd.f32 1e-10, %s2503_s28 }
 0x65b   :  { %v1968_v46 = vstv %s1967_s30 }
 0x65c   :  { %2619 = vrcp.f32 %v1968_v46 }
 0x65d   :  { %2621 = vrsqrt.f32 %v2019_v27 }
 0x666   :  { %v2620_v47 = vpop.eup %2619 }
 0x667   :  { %2504 = vpush %v2620_v47  ;;  %v2622_v32 = vpop.eup %2621 }
 0x668   :  { %2506 = vpush %v2003_v25  ;;  %v2021_v21 = vmul.f32 %v2622_v32, %v2019_v27 }
 0x66a   :  { %v2023_v38 = vsel %vm2022_vm0, %v2019_v27, %v2021_v21 }
 0x66b   :  { %v2026_v48 = vsel %vm2024_vm4, %v2025_v52, %v2023_v38 }
 0x698   :  { %s2505_s4 = spop %2504 }
 0x699   :  { %s1971_s6 = smul.f32 %s2505_s4, %s2501_s27  ;;  %s2507_s7 = spop %2506 }
 0x69a   :  { %s2005_s8 = smul.f32 0.00024414063, %s2507_s7 }
 0x69b   :  { %s4256_s9 = sadd.f32 %s1971_s6, %s4249_s23 }
 0x69c   :  { %s2006_s10 = smax.f32 %s2645_s21, %s2005_s8 }
 0x69d   :  { %s2007_s11 = sadd.f32 1e-08, %s2006_s10 }
 0x69f   :  { %v2008_v50 = vstv %s2007_s11 }
 0x6a0   :  { %2623 = vrsqrt.f32 %v2008_v50  ;;  %vm2011_vm1 = vcmp.eq.f32.partialorder %v2008_v50, inf  ;;  %v2014_v29 = vand.u32 2147483648, %v2008_v50  ;;  %vm2013_vm3 = vcmp.eq.f32.partialorder %v2008_v50, 0.0 }
 0x6aa   :  { %v2624_v44 = vpop.eup %2623 }
 0x6ab   :  { %v2010_v20 = vmul.f32 %v2624_v44, %v2008_v50 }
 0x6ad   :  { %v2012_v6 = vsel %vm2011_vm1, %v2008_v50, %v2010_v20 }
 0x6ae   :  { %v2015_v24 = vsel %vm2013_vm3, %v2014_v29, %v2012_v6 }
 0x6af   :  { %2508 = vpush %v2015_v24 }
 0x6b0   :  { %2510 = vpush %v2026_v48 }
 0x6e0   :  { %s2509_s29 = spop %2508 }
 0x6e1   :  { %s2511_s12 = spop %2510 }
 0x6e2   :  { %s2028_s13 = sadd.f32 1e-10, %s2511_s12 }
 0x6e4   :  { %v2029_v3 = vstv %s2028_s13 }
 0x6e5   :  { %2625 = vrcp.f32 %v2029_v3 }
 0x6e6   :  { %2627 = vrsqrt.f32 %v2080_v28 }
 0x6ef   :  { %v2626_v58 = vpop.eup %2625 }
 0x6f0   :  { %2512 = vpush %v2626_v58  ;;  %v2628_v14 = vpop.eup %2627 }
 0x6f1   :  { %2514 = vpush %v2064_v4  ;;  %v2082_v31 = vmul.f32 %v2628_v14, %v2080_v28 }
 0x6f3   :  { %v2084_v63 = vsel %vm2083_vm6, %v2080_v28, %v2082_v31 }
 0x6f4   :  { %v2087_v2 = vsel %vm2085_vm9, %v2086_v34, %v2084_v63 }
 0x721   :  { %s2513_s15 = spop %2512 }
 0x722   :  { %s2032_s16 = smul.f32 %s2513_s15, %s2509_s29  ;;  %s2515_s17 = spop %2514 }
 0x723   :  { %s2066_s18 = smul.f32 0.00024414063, %s2515_s17 }
 0x724   :  { %s4263_s19 = sadd.f32 %s2032_s16, %s4256_s9 }
 0x725   :  { %s2067_s20 = smax.f32 %s2645_s21, %s2066_s18 }
 0x726   :  { %s2068_s22 = sadd.f32 1e-08, %s2067_s20 }
 0x728   :  { %v2069_v36 = vstv %s2068_s22 }
 0x729   :  { %2629 = vrsqrt.f32 %v2069_v36  ;;  %vm2072_vm7 = vcmp.eq.f32.partialorder %v2069_v36, inf  ;;  %v2075_v9 = vand.u32 2147483648, %v2069_v36  ;;  %vm2074_vm8 = vcmp.eq.f32.partialorder %v2069_v36, 0.0 }
 0x733   :  { %v2630_v39 = vpop.eup %2629 }
 0x734   :  { %v2071_v45 = vmul.f32 %v2630_v39, %v2069_v36 }
 0x736   :  { %v2073_v62 = vsel %vm2072_vm7, %v2069_v36, %v2071_v45 }
 0x737   :  { %v2076_v5 = vsel %vm2074_vm8, %v2075_v9, %v2073_v62 }
 0x738   :  { %2516 = vpush %v2076_v5 }
 0x739   :  { %2518 = vpush %v2087_v2 }
 0x769   :  { %s2517_s21 = spop %2516 }
 0x76a   :  { %s2519_s5 = spop %2518 }
 0x76b   :  { %s2089_s0 = sadd.f32 1e-10, %s2519_s5 }
 0x76d   :  { %v2090_v56 = vstv %s2089_s0 }
 0x76e   :  { %2631 = vrcp.f32 %v2090_v56 }
 0x778   :  { %v2632_v37 = vpop.eup %2631 }
 0x779   :  { %2520 = vpush %v2632_v37 }
 0x7aa   :  { %s2521_s23 = spop %2520 }
 0x7ab   :  { %s2093_s25 = smul.f32 %s2521_s23, %s2517_s21 }
 0x7ad   :  { %s2094_s26 = sadd.f32 %s2093_s25, %s4263_s19 }
 0x7af   :  { %s2095_s27 = smul.f32 0.5, %s2094_s26 }
 0x7b1   :  { %s2098_s28 = smul.f32 0.1, %s2095_s27 }
 0x7b3   :  { %2100 = sst [smem:[#allocation2]] %s2098_s28 }
 0x7b4   :  { %2642 = shalt.err (!%p2639_p2)
}
 0x7b5   :  { %s2646_s9 = smov [#allocation2]  }
 0x7b6   :  { %2108 = dma.smem_to_hbm %s2646_s9, 16, %s4280_s1, [#allocation3]  }
 0x7b7   :  { %2643 = dma.done.wait [#allocation3], 16  }
 0x7b8   :  { %2644 = vsyncadd [#allocation3], 4294967280 }
 0x7b9   :  { %2112 = sfence }
 0x7ba   :  { %2113 = vsyncpa [#allocation3], 1 }

</bundles_post_ra>
